<compile_context>
chip_gen: v7x
topology: tpu7x:2x2x1
jax: 0.10.0
libtpu: 0.0.40
codegen_flags: <defaults>
</compile_context>

<pallas_src>
import functools

import jax
import jax.numpy as jnp
from jax.experimental import pallas as pl
from jax.experimental.pallas import tpu as pltpu

EPS = 1e-6  # matches the PyTorch module-level EPS


def _vn_kernel(x_ref, wf_ref, wd_ref, bns_ref, bnb_ref, o_ref, *,
               apply_bn, leaky_relu, negative_slope, eps):
    # x_ref : (C_in, 3, tn)     wf_ref : (C_out, C_in)     wd_ref : (C_dir, C_out)
    # bns_ref/bnb_ref : (C_out, 1)   o_ref : (C_out, 3, tn)
    wf = wf_ref[...]
    wd = wd_ref[...].astype(jnp.float32)

    # First VN linear: one MXU matmul per vector component, f32 accumulation.
    p = [jnp.dot(wf, x_ref[:, d, :], preferred_element_type=jnp.float32)
         for d in range(3)]                                   # 3 x (C_out, tn) f32

    if apply_bn:
        # Inference-mode VNBatchNorm: per-channel affine on the vector norm.
        norm = jnp.sqrt(p[0] * p[0] + p[1] * p[1] + p[2] * p[2])   # (C_out, tn)
        norm_bn = norm * bns_ref[...] + bnb_ref[...]               # (C_out, tn)
        p = [pi / norm * norm_bn for pi in p]

    # Direction features (map_to_dir): reuse the tile already resident in VMEM.
    dvec = [jnp.dot(wd, pi, preferred_element_type=jnp.float32)
            for pi in p]                                      # 3 x (C_dir, tn)

    dotprod = p[0] * dvec[0] + p[1] * dvec[1] + p[2] * dvec[2]           # (C_out, tn)
    d_norm_sq = dvec[0] * dvec[0] + dvec[1] * dvec[1] + dvec[2] * dvec[2]  # (C_dir, tn)
    coef = dotprod / (d_norm_sq + eps)
    keep = dotprod >= 0.0

    for d in range(3):
        corrected = jnp.where(keep, p[d], p[d] - coef * dvec[d])
        if leaky_relu:
            out_d = negative_slope * p[d] + (1.0 - negative_slope) * corrected
        else:
            out_d = corrected
        o_ref[:, d, :] = out_d.astype(o_ref.dtype)


def _pick_tile(n):
    # Prefer a lane-dense (multiple-of-128) tile that divides N; fall back to full extent,
    # which is always a legal block dim (no divisibility assert, handles any N).
    for t in (512, 256, 128):
        if n % t == 0:
            return t
    return n


def vn_linear_and_leaky_relu(x, w_feat, w_dir, bn_scale, bn_bias, *,
                             negative_slope=0.2, leaky_relu=False,
                             use_batchnorm=True, eps=EPS, n_tile=None):
    """Fused VNLinearAndLeakyReLU forward.

    x        : [B, C_in, 3, N]
    w_feat   : [C_out, C_in]   (nn.Linear weight, no bias)
    w_dir    : [C_dir, C_out]  (C_dir = C_out, or 1 for share_nonlinearity=True)
    bn_scale : [C_out]  = gamma / sqrt(running_var + bn_eps)      (eval-mode BN)
    bn_bias  : [C_out]  = beta - running_mean * bn_scale
    returns  : [B, C_out, 3, N]
    """
    B, Cin, D3, N = x.shape
    assert D3 == 3, "vector-neuron features must have a 3-axis"
    Cout = w_feat.shape[0]
    Cdir = w_dir.shape[0]

    tn = n_tile if n_tile is not None else _pick_tile(N)
    assert N % tn == 0

    bn_scale2 = jnp.asarray(bn_scale, jnp.float32).reshape(Cout, 1)
    bn_bias2 = jnp.asarray(bn_bias, jnp.float32).reshape(Cout, 1)

    kernel = functools.partial(
        _vn_kernel,
        apply_bn=bool(use_batchnorm),
        leaky_relu=bool(leaky_relu),
        negative_slope=float(negative_slope),
        eps=float(eps),
    )

    grid = (B, N // tn)
    return pl.pallas_call(
        kernel,
        out_shape=jax.ShapeDtypeStruct((B, Cout, 3, N), x.dtype),
        grid=grid,
        in_specs=[
            pl.BlockSpec((None, Cin, 3, tn), lambda b, j: (b, 0, 0, j)),
            pl.BlockSpec((Cout, Cin), lambda b, j: (0, 0)),
            pl.BlockSpec((Cdir, Cout), lambda b, j: (0, 0)),
            pl.BlockSpec((Cout, 1), lambda b, j: (0, 0)),
            pl.BlockSpec((Cout, 1), lambda b, j: (0, 0)),
        ],
        out_specs=pl.BlockSpec((None, Cout, 3, tn), lambda b, j: (b, 0, 0, j)),
        compiler_params=pltpu.CompilerParams(
            dimension_semantics=("parallel", "parallel")),
    )(x, w_feat, w_dir, bn_scale2, bn_bias2)


if __name__ == "__main__":
    # Small shapes consistent with the module: B=2, in_channels=32, out_channels=64,
    # 3 vector components, N_samples=16. Default config: leaky_relu=False,
    # share_nonlinearity=False, use_batchnorm='norm' (eval mode), negative_slope=0.2.
    B, Cin, Cout, Nsamp = 2, 32, 64, 16
    negative_slope = 0.2
    leaky_relu_flag = False
    use_bn = True

    key = jax.random.PRNGKey(0)
    kx, kwf, kwd, kg, kb, km, kv = jax.random.split(key, 7)
    x = jax.random.normal(kx, (B, Cin, 3, Nsamp), dtype=jnp.float32)
    w_feat = (jax.random.uniform(kwf, (Cout, Cin), dtype=jnp.float32) - 0.5) * (2.0 / jnp.sqrt(Cin))
    w_dir = (jax.random.uniform(kwd, (Cout, Cout), dtype=jnp.float32) - 0.5) * (2.0 / jnp.sqrt(Cout))

    # Eval-mode BatchNorm parameters (non-trivial so the fused BN path is exercised).
    bn_eps = 1e-5
    gamma = 1.0 + 0.1 * jax.random.normal(kg, (Cout,), dtype=jnp.float32)
    beta = 0.1 * jax.random.normal(kb, (Cout,), dtype=jnp.float32)
    run_mean = 0.1 * jax.random.normal(km, (Cout,), dtype=jnp.float32)
    run_var = jnp.abs(1.0 + 0.1 * jax.random.normal(kv, (Cout,), dtype=jnp.float32))
    bn_scale = gamma / jnp.sqrt(run_var + bn_eps)
    bn_bias = beta - run_mean * bn_scale

    y = vn_linear_and_leaky_relu(
        x, w_feat, w_dir, bn_scale, bn_bias,
        negative_slope=negative_slope, leaky_relu=leaky_relu_flag,
        use_batchnorm=use_bn)
    y = jax.block_until_ready(y)

    # Pure-JAX reference replicating the PyTorch forward (eval-mode BN).
    def reference(xr):
        hi = jax.lax.Precision.HIGHEST
        p = jnp.einsum("oi,bidn->bodn", w_feat, xr, precision=hi)
        if use_bn:
            norm = jnp.sqrt(jnp.sum(p * p, axis=2, keepdims=True))
            norm_bn = norm * bn_scale[None, :, None, None] + bn_bias[None, :, None, None]
            p = p / norm * norm_bn
        d = jnp.einsum("oi,bidn->bodn", w_dir, p, precision=hi)
        dot = jnp.sum(p * d, axis=2, keepdims=True)
        dsq = jnp.sum(d * d, axis=2, keepdims=True)
        corr = jnp.where(dot >= 0, p, p - dot / (dsq + EPS) * d)
        if leaky_relu_flag:
            return negative_slope * p + (1.0 - negative_slope) * corr
        return corr

    y_ref = reference(x)
    assert y.shape == (B, Cout, 3, Nsamp), y.shape
    max_err = float(jnp.max(jnp.abs(y - y_ref)))
    assert jnp.allclose(y, y_ref, atol=1e-3, rtol=1e-3), f"mismatch vs reference, max_err={max_err}"
    print("KERNEL_OK")
</pallas_src>

<mosaic_0001>
module attributes {stable_mosaic.version = 11 : i64} {
  func.func @_vn_kernel(%arg0: i32, %arg1: i32, %arg2: memref<1x32x3x16xf32, #tpu.memory_space<vmem>>, %arg3: memref<64x32xf32, #tpu.memory_space<vmem>>, %arg4: memref<64x64xf32, #tpu.memory_space<vmem>>, %arg5: memref<64x1xf32, #tpu.memory_space<vmem>>, %arg6: memref<64x1xf32, #tpu.memory_space<vmem>>, %arg7: memref<1x64x3x16xf32, #tpu.memory_space<vmem>>) attributes {dimension_semantics = [#tpu.dimension_semantics<parallel>, #tpu.dimension_semantics<parallel>], iteration_bounds = array<i64: 2, 1>, scalar_prefetch = 0 : i64, scratch_operands = 0 : i64, tpu.core_type = #tpu.core_type<tc>, window_params = [{transform_indices = @transform_0, window_bounds = array<i64: 1, 32, 3, 16>}, {pipeline_mode = #tpu.pipeline_mode<synchronous>, transform_indices = @transform_1, window_bounds = array<i64: 64, 32>}, {pipeline_mode = #tpu.pipeline_mode<synchronous>, transform_indices = @transform_2, window_bounds = array<i64: 64, 64>}, {pipeline_mode = #tpu.pipeline_mode<synchronous>, transform_indices = @transform_3, window_bounds = array<i64: 64, 1>}, {pipeline_mode = #tpu.pipeline_mode<synchronous>, transform_indices = @transform_4, window_bounds = array<i64: 64, 1>}, {transform_indices = @transform_5, window_bounds = array<i64: 1, 64, 3, 16>}]} {
    %c0 = arith.constant 0 : index
    %c0_0 = arith.constant 0 : index
    %0 = vector.load %arg3[%c0, %c0_0] : memref<64x32xf32, #tpu.memory_space<vmem>>, vector<64x32xf32>
    %c0_1 = arith.constant 0 : index
    %c0_2 = arith.constant 0 : index
    %1 = vector.load %arg4[%c0_1, %c0_2] : memref<64x64xf32, #tpu.memory_space<vmem>>, vector<64x64xf32>
    %c0_3 = arith.constant 0 : index
    %c0_4 = arith.constant 0 : index
    %c0_5 = arith.constant 0 : index
    %c0_6 = arith.constant 0 : index
    %2 = vector.load %arg2[%c0_3, %c0_4, %c0_5, %c0_6] : memref<1x32x3x16xf32, #tpu.memory_space<vmem>>, vector<1x32x1x16xf32>
    %3 = vector.shape_cast %2 : vector<1x32x1x16xf32> to vector<32x16xf32>
    %cst = arith.constant dense<0.000000e+00> : vector<64x16xf32>
    %4 = tpu.matmul %0, %3, %cst {dimension_numbers = #tpu.dot_dimension_numbers<[1], [0], [0], [1], [0, 0, 1, 1], [], []>} : vector<64x32xf32>, vector<32x16xf32>, vector<64x16xf32> -> vector<64x16xf32>
    %c0_7 = arith.constant 0 : index
    %c0_8 = arith.constant 0 : index
    %c1 = arith.constant 1 : index
    %c0_9 = arith.constant 0 : index
    %5 = vector.load %arg2[%c0_7, %c0_8, %c1, %c0_9] : memref<1x32x3x16xf32, #tpu.memory_space<vmem>>, vector<1x32x1x16xf32>
    %6 = vector.shape_cast %5 : vector<1x32x1x16xf32> to vector<32x16xf32>
    %cst_10 = arith.constant dense<0.000000e+00> : vector<64x16xf32>
    %7 = tpu.matmul %0, %6, %cst_10 {dimension_numbers = #tpu.dot_dimension_numbers<[1], [0], [0], [1], [0, 0, 1, 1], [], []>} : vector<64x32xf32>, vector<32x16xf32>, vector<64x16xf32> -> vector<64x16xf32>
    %c0_11 = arith.constant 0 : index
    %c0_12 = arith.constant 0 : index
    %c2 = arith.constant 2 : index
    %c0_13 = arith.constant 0 : index
    %8 = vector.load %arg2[%c0_11, %c0_12, %c2, %c0_13] : memref<1x32x3x16xf32, #tpu.memory_space<vmem>>, vector<1x32x1x16xf32>
    %9 = vector.shape_cast %8 : vector<1x32x1x16xf32> to vector<32x16xf32>
    %cst_14 = arith.constant dense<0.000000e+00> : vector<64x16xf32>
    %10 = tpu.matmul %0, %9, %cst_14 {dimension_numbers = #tpu.dot_dimension_numbers<[1], [0], [0], [1], [0, 0, 1, 1], [], []>} : vector<64x32xf32>, vector<32x16xf32>, vector<64x16xf32> -> vector<64x16xf32>
    %11 = arith.mulf %4, %4 : vector<64x16xf32>
    %12 = arith.mulf %7, %7 : vector<64x16xf32>
    %13 = arith.addf %11, %12 : vector<64x16xf32>
    %14 = arith.mulf %10, %10 : vector<64x16xf32>
    %15 = arith.addf %13, %14 : vector<64x16xf32>
    %16 = math.sqrt %15 : vector<64x16xf32>
    %c0_15 = arith.constant 0 : index
    %c0_16 = arith.constant 0 : index
    %17 = vector.load %arg5[%c0_15, %c0_16] : memref<64x1xf32, #tpu.memory_space<vmem>>, vector<64x1xf32>
    %18 = vector.broadcast %17 : vector<64x1xf32> to vector<64x16xf32>
    %19 = arith.mulf %16, %18 : vector<64x16xf32>
    %c0_17 = arith.constant 0 : index
    %c0_18 = arith.constant 0 : index
    %20 = vector.load %arg6[%c0_17, %c0_18] : memref<64x1xf32, #tpu.memory_space<vmem>>, vector<64x1xf32>
    %21 = vector.broadcast %20 : vector<64x1xf32> to vector<64x16xf32>
    %22 = arith.addf %19, %21 : vector<64x16xf32>
    %23 = arith.divf %4, %16 : vector<64x16xf32>
    %24 = arith.mulf %23, %22 : vector<64x16xf32>
    %25 = arith.divf %7, %16 : vector<64x16xf32>
    %26 = arith.mulf %25, %22 : vector<64x16xf32>
    %27 = arith.divf %10, %16 : vector<64x16xf32>
    %28 = arith.mulf %27, %22 : vector<64x16xf32>
    %cst_19 = arith.constant dense<0.000000e+00> : vector<64x16xf32>
    %29 = tpu.matmul %1, %24, %cst_19 {dimension_numbers = #tpu.dot_dimension_numbers<[1], [0], [0], [1], [0, 0, 1, 1], [], []>} : vector<64x64xf32>, vector<64x16xf32>, vector<64x16xf32> -> vector<64x16xf32>
    %cst_20 = arith.constant dense<0.000000e+00> : vector<64x16xf32>
    %30 = tpu.matmul %1, %26, %cst_20 {dimension_numbers = #tpu.dot_dimension_numbers<[1], [0], [0], [1], [0, 0, 1, 1], [], []>} : vector<64x64xf32>, vector<64x16xf32>, vector<64x16xf32> -> vector<64x16xf32>
    %cst_21 = arith.constant dense<0.000000e+00> : vector<64x16xf32>
    %31 = tpu.matmul %1, %28, %cst_21 {dimension_numbers = #tpu.dot_dimension_numbers<[1], [0], [0], [1], [0, 0, 1, 1], [], []>} : vector<64x64xf32>, vector<64x16xf32>, vector<64x16xf32> -> vector<64x16xf32>
    %32 = arith.mulf %24, %29 : vector<64x16xf32>
    %33 = arith.mulf %26, %30 : vector<64x16xf32>
    %34 = arith.addf %32, %33 : vector<64x16xf32>
    %35 = arith.mulf %28, %31 : vector<64x16xf32>
    %36 = arith.addf %34, %35 : vector<64x16xf32>
    %37 = arith.mulf %29, %29 : vector<64x16xf32>
    %38 = arith.mulf %30, %30 : vector<64x16xf32>
    %39 = arith.addf %37, %38 : vector<64x16xf32>
    %40 = arith.mulf %31, %31 : vector<64x16xf32>
    %41 = arith.addf %39, %40 : vector<64x16xf32>
    %cst_22 = arith.constant 9.99999997E-7 : f32
    %42 = vector.broadcast %cst_22 : f32 to vector<64x16xf32>
    %43 = arith.addf %41, %42 : vector<64x16xf32>
    %44 = arith.divf %36, %43 : vector<64x16xf32>
    %cst_23 = arith.constant 0.000000e+00 : f32
    %45 = vector.broadcast %cst_23 : f32 to vector<64x16xf32>
    %46 = arith.cmpf oge, %36, %45 : vector<64x16xf32>
    %47 = arith.mulf %44, %29 : vector<64x16xf32>
    %48 = arith.subf %24, %47 : vector<64x16xf32>
    %49 = arith.select %46, %24, %48 : vector<64x16xi1>, vector<64x16xf32>
    %c0_24 = arith.constant 0 : index
    %c0_25 = arith.constant 0 : index
    %c0_26 = arith.constant 0 : index
    %c0_27 = arith.constant 0 : index
    %50 = vector.load %arg7[%c0_24, %c0_25, %c0_26, %c0_27] : memref<1x64x3x16xf32, #tpu.memory_space<vmem>>, vector<1x64x1x16xf32>
    %51 = vector.shape_cast %50 : vector<1x64x1x16xf32> to vector<64x16xf32>
    %52 = vector.shape_cast %49 : vector<64x16xf32> to vector<1x64x1x16xf32>
    tpu.vector_store %arg7[%c0_24, %c0_25, %c0_26, %c0_27], %52 {strides = array<i32>} : memref<1x64x3x16xf32, #tpu.memory_space<vmem>>, vector<1x64x1x16xf32>,
    %53 = arith.mulf %44, %30 : vector<64x16xf32>
    %54 = arith.subf %26, %53 : vector<64x16xf32>
    %55 = arith.select %46, %26, %54 : vector<64x16xi1>, vector<64x16xf32>
    %c0_28 = arith.constant 0 : index
    %c0_29 = arith.constant 0 : index
    %c1_30 = arith.constant 1 : index
    %c0_31 = arith.constant 0 : index
    %56 = vector.load %arg7[%c0_28, %c0_29, %c1_30, %c0_31] : memref<1x64x3x16xf32, #tpu.memory_space<vmem>>, vector<1x64x1x16xf32>
    %57 = vector.shape_cast %56 : vector<1x64x1x16xf32> to vector<64x16xf32>
    %58 = vector.shape_cast %55 : vector<64x16xf32> to vector<1x64x1x16xf32>
    tpu.vector_store %arg7[%c0_28, %c0_29, %c1_30, %c0_31], %58 {strides = array<i32>} : memref<1x64x3x16xf32, #tpu.memory_space<vmem>>, vector<1x64x1x16xf32>,
    %59 = arith.mulf %44, %31 : vector<64x16xf32>
    %60 = arith.subf %28, %59 : vector<64x16xf32>
    %61 = arith.select %46, %28, %60 : vector<64x16xi1>, vector<64x16xf32>
    %c0_32 = arith.constant 0 : index
    %c0_33 = arith.constant 0 : index
    %c2_34 = arith.constant 2 : index
    %c0_35 = arith.constant 0 : index
    %62 = vector.load %arg7[%c0_32, %c0_33, %c2_34, %c0_35] : memref<1x64x3x16xf32, #tpu.memory_space<vmem>>, vector<1x64x1x16xf32>
    %63 = vector.shape_cast %62 : vector<1x64x1x16xf32> to vector<64x16xf32>
    %64 = vector.shape_cast %61 : vector<64x16xf32> to vector<1x64x1x16xf32>
    tpu.vector_store %arg7[%c0_32, %c0_33, %c2_34, %c0_35], %64 {strides = array<i32>} : memref<1x64x3x16xf32, #tpu.memory_space<vmem>>, vector<1x64x1x16xf32>,
    return
  }
  func.func @transform_0(%arg0: i32, %arg1: i32) -> (i32, i32, i32, i32) {
    %c0_i32 = arith.constant 0 : i32
    %c0_i32_0 = arith.constant 0 : i32
    %c0_i32_1 = arith.constant 0 : i32
    return %arg0, %c0_i32, %c0_i32_0, %arg1 : i32, i32, i32, i32
  }
  func.func @transform_1(%arg0: i32, %arg1: i32) -> (i32, i32) {
    %c0_i32 = arith.constant 0 : i32
    %c0_i32_0 = arith.constant 0 : i32
    %c0_i32_1 = arith.constant 0 : i32
    return %c0_i32, %c0_i32_0 : i32, i32
  }
  func.func @transform_2(%arg0: i32, %arg1: i32) -> (i32, i32) {
    %c0_i32 = arith.constant 0 : i32
    %c0_i32_0 = arith.constant 0 : i32
    %c0_i32_1 = arith.constant 0 : i32
    return %c0_i32, %c0_i32_0 : i32, i32
  }
  func.func @transform_3(%arg0: i32, %arg1: i32) -> (i32, i32) {
    %c0_i32 = arith.constant 0 : i32
    %c0_i32_0 = arith.constant 0 : i32
    %c0_i32_1 = arith.constant 0 : i32
    return %c0_i32, %c0_i32_0 : i32, i32
  }
  func.func @transform_4(%arg0: i32, %arg1: i32) -> (i32, i32) {
    %c0_i32 = arith.constant 0 : i32
    %c0_i32_0 = arith.constant 0 : i32
    %c0_i32_1 = arith.constant 0 : i32
    return %c0_i32, %c0_i32_0 : i32, i32
  }
  func.func @transform_5(%arg0: i32, %arg1: i32) -> (i32, i32, i32, i32) {
    %c0_i32 = arith.constant 0 : i32
    %c0_i32_0 = arith.constant 0 : i32
    %c0_i32_1 = arith.constant 0 : i32
    return %arg0, %c0_i32, %c0_i32_0, %arg1 : i32, i32, i32, i32
  }
}

</mosaic_0001>

<bundles_post_ra>
// kernel: tpu_custom_call.1
= control target key start
LH: loop header
LB: loop body
LE: loop exit
PB: predicated region body
PF: predicated region fallthrough
CT: control target
= control target key end

     0   :  { %s3940_s18 = smov 0   ;;  %s3942_s19 = smov 0   ;;  %s5496_s0 = inlined_call_operand.vmem [shape: f32[2,32,3,16], index: 0, kind: input, shape index: {}]   ;;  %s5497_s1 = inlined_call_operand.vmem [shape: f32[64,32], index: 1, kind: input, shape index: {}]   ;;  %s5498_s2 = inlined_call_operand.vmem [shape: f32[64,64], index: 2, kind: input, shape index: {}]   ;;  %s5499_s3 = inlined_call_operand.vmem [shape: f32[64,1], index: 3, kind: input, shape index: {}]   ;;  %s5500_s4 = inlined_call_operand.vmem [shape: f32[64,1], index: 4, kind: input, shape index: {}]   ;;  %s5501_s5 = inlined_call_operand.vmem [shape: f32[2,64,3,16], index: 5, kind: output, shape index: {}]  }
   0x1   :  { %s3944_s20 = smov 0  }
   0x2 LB: > { %s27_s21 = sadd.s32 1, %s3902_s19  ;;  %p3451_p0 = scmp.ge.s32.totalorder %s3906_s20, 1  ;;  %s3906_s20 = sphi %s3944_s20, %s15_s20   ;;  %s3902_s19 = sphi %s3942_s19, %s5550_s19   ;;  %s3898_s18 = sphi %s3940_s18, %s5549_s18  }
   0x3   : > { %p29_p1 = scmp.ge.s32.totalorder %s27_s21, 2  ;;  %p206_p2 = scmp.lt.s32.totalorder %s3906_s20, 3 }
   0x5   : > { %s5552_s21 = smov (%p29_p1, %s27_s21), 0  ;;  %p207_p3 = pnand %p3451_p0, %p206_p2 }
   0x7   : > { %210 = sbr.rel (%p207_p3) target bundleno = 719 (0x2cf), region = 40 }
   0xe   : > { %p240_p4 = scmp.lt.s32.totalorder %s3898_s18, 1  ;;  %v3961_v0 = vld [vmem:[%s5497_s1] sm:$0xff]  ;;  %vm403_vm0 = vcmask 261120   ;;  %v3908_v1 = vmov 0   ;;  %vm337_vm1 = vcmask 1041409   ;;  %v1144_v4 = vld [vmem:[%s5500_s4 + $0x8] sm:$0xff] }
   0xf   : > { %3600 = vmatprep.mubr.msk.f32.mxu0 %vm403_vm0, %v3961_v0  ;;  %3620 = vmatprep.mubr.msk.f32.mxu1 %vm403_vm0, %v3961_v0  ;;  %v1143_v2 = vld [vmem:[%s5500_s4] sm:$0xff]  ;;  %vm340_vm2 = vcmask 1042434   ;;  %vm343_vm3 = vcmask 1043459   ;;  %vm346_vm4 = vcmask 1044484   ;;  %vm349_vm5 = vcmask 1045509   ;;  %v1088_v5 = vld [vmem:[%s5499_s3 + $0x8] sm:$0xff] }
  0x10   : > { %s5554_s18 = smov (!%p240_p4, %s3898_s18), 1  ;;  %3835 = vset.pattern.permute.xlu1 %v3908_v1  ;;  %3834 = vset.pattern.permute.xlu0 %v3908_v1  ;;  %v1087_v3 = vld [vmem:[%s5499_s3] sm:$0xff]  ;;  %v1090_v9 = vld [vmem:[%s5499_s3 + $0x18] sm:$0xff]  ;;  %v1089_v14 = vld [vmem:[%s5499_s3 + $0x10] sm:$0xff]  ;;  %vm352_vm6 = vcmask 1046534   ;;  %vm355_vm7 = vcmask 1047559  }
  0x11   : > { %s3506_s26 = sshll.u32 %s5554_s18, 7  ;;  %1153 = vperm.xlu1 %3835, %v1143_v2   ;;  %1097 = vperm.xlu0 %3834, %v1087_v3   ;;  %v1146_v36 = vld [vmem:[%s5500_s4 + $0x18] sm:$0xff]  ;;  %v1145_v41 = vld [vmem:[%s5500_s4 + $0x10] sm:$0xff]  ;;  %vm1255_vm8 = vcmask 523264   ;;  %s3507_s28 = sshll.u32 %s5554_s18, 8 }
  0x12   : > { %s3979_s6 = scalar_lea.vmem %s5496_s0, %s3506_s26  ;;  %s4811_s30 = scalar_lea.vmem %s5501_s5, %s3507_s28 }
  0x13   : > { %v273_v6 = vld [vmem:[%s3979_s6 + $0x4] sm:$0x1]  ;;  %v274_v7 = vld [vmem:[%s3979_s6 + $0x8] sm:$0x1]  ;;  %v275_v8 = vld [vmem:[%s3979_s6 + $0xc] sm:$0x1] }
  0x14   : > { %v272_v10 = vld [vmem:[%s3979_s6] sm:$0x1]  ;;  %v276_v11 = vld [vmem:[%s3979_s6 + $0x10] sm:$0x1]  ;;  %v277_v12 = vld [vmem:[%s3979_s6 + $0x14] sm:$0x1] }
  0x15   : > { %v278_v13 = vld [vmem:[%s3979_s6 + $0x18] sm:$0x1]  ;;  %1158 = vperm.xlu1 %3835, %v1144_v4   ;;  %v279_v15 = vld [vmem:[%s3979_s6 + $0x1c] sm:$0x1]  ;;  %v280_v16 = vld [vmem:[%s3979_s6 + $0x20] sm:$0x1]  ;;  %1102 = vperm.xlu0 %3834, %v1088_v5  }
  0x16   : > { %v281_v17 = vld [vmem:[%s3979_s6 + $0x24] sm:$0x1]  ;;  %v282_v18 = vld [vmem:[%s3979_s6 + $0x28] sm:$0x1]  ;;  %v283_v19 = vld [vmem:[%s3979_s6 + $0x2c] sm:$0x1] }
  0x17   : > { %v284_v20 = vld [vmem:[%s3979_s6 + $0x30] sm:$0x1]  ;;  %v285_v21 = vld [vmem:[%s3979_s6 + $0x34] sm:$0x1]  ;;  %v286_v22 = vld [vmem:[%s3979_s6 + $0x38] sm:$0x1] }
  0x18   : > { %v336_v23 = vrot.slane %v273_v6, 7  ;;  %v339_v24 = vrot.slane %v274_v7, 6  ;;  %v342_v25 = vrot.slane %v275_v8, 5  ;;  %v287_v26 = vld [vmem:[%s3979_s6 + $0x3c] sm:$0x1]  ;;  %v345_v27 = vrot.slane %v276_v11, 4 }
  0x19   : > { %v348_v28 = vrot.slane %v277_v12, 3  ;;  %v351_v29 = vrot.slane %v278_v13, 2  ;;  %v357_v30 = vrot.slane %v281_v17, 7  ;;  %1112 = vperm.xlu1 %3835, %v1090_v9   ;;  %v359_v32 = vrot.slane %v282_v18, 6  ;;  %v534_v35 = vld [vmem:[%s3979_s6 + $0x5] sm:$0x1]  ;;  %1107 = vperm.xlu0 %3834, %v1089_v14  }
  0x1a   : > { %v338_v31 = vsel %vm337_vm1, %v336_v23, %v272_v10  ;;  %v361_v33 = vrot.slane %v283_v19, 5  ;;  %v363_v34 = vrot.slane %v284_v20, 4  ;;  %v354_v38 = vrot.slane %v279_v15, 1  ;;  %v533_v45 = vld [vmem:[%s3979_s6 + $0x1] sm:$0x1]  ;;  %v1092_v13 = vld [vmem:[%s5499_s3 + $0x28] sm:$0xff] }
  0x1b   : > { %v341_v37 = vsel %vm340_vm2, %v339_v24, %v338_v31  ;;  %v358_v39 = vsel %vm337_vm1, %v357_v30, %v280_v16  ;;  %v365_v40 = vrot.slane %v285_v21, 3  ;;  %v367_v44 = vrot.slane %v286_v22, 2  ;;  %v535_v46 = vld [vmem:[%s3979_s6 + $0x9] sm:$0x1]  ;;  %v536_v51 = vld [vmem:[%s3979_s6 + $0xd] sm:$0x1] }
  0x1c   : > { %v344_v42 = vsel %vm343_vm3, %v342_v25, %v341_v37  ;;  %v360_v43 = vsel %vm340_vm2, %v359_v32, %v358_v39  ;;  %v597_v47 = vrot.slane %v534_v35, 7  ;;  %v369_v50 = vrot.slane %v287_v26, 1  ;;  %v537_v52 = vld [vmem:[%s3979_s6 + $0x11] sm:$0x1]  ;;  %v538_v55 = vld [vmem:[%s3979_s6 + $0x15] sm:$0x1] }
  0x1d   : > { %v347_v48 = vsel %vm346_vm4, %v345_v27, %v344_v42  ;;  %v362_v49 = vsel %vm343_vm3, %v361_v33, %v360_v43  ;;  %1168 = vperm.xlu1 %3835, %v1146_v36   ;;  %v539_v56 = vld [vmem:[%s3979_s6 + $0x19] sm:$0x1]  ;;  %v540_v57 = vld [vmem:[%s3979_s6 + $0x1d] sm:$0x1]  ;;  %1163 = vperm.xlu0 %3834, %v1145_v41   ;;  %v541_v60 = vld [vmem:[%s3979_s6 + $0x21] sm:$0x1] }
  0x1e   : > { %v350_v53 = vsel %vm349_vm5, %v348_v28, %v347_v48  ;;  %v364_v54 = vsel %vm346_vm4, %v363_v34, %v362_v49  ;;  %v542_v61 = vld [vmem:[%s3979_s6 + $0x25] sm:$0x1]  ;;  %v543_v62 = vld [vmem:[%s3979_s6 + $0x29] sm:$0x1]  ;;  %v544_v63 = vld [vmem:[%s3979_s6 + $0x2d] sm:$0x1]  ;;  %v598_v1 = vsel %vm337_vm1, %v597_v47, %v533_v45 }
  0x1f   : > { %v353_v58 = vsel %vm352_vm6, %v351_v29, %v350_v53  ;;  %v366_v59 = vsel %vm349_vm5, %v365_v40, %v364_v54  ;;  %v545_v4 = vld [vmem:[%s3979_s6 + $0x31] sm:$0x1]  ;;  %v546_v5 = vld [vmem:[%s3979_s6 + $0x35] sm:$0x1]  ;;  %v599_v6 = vrot.slane %v535_v46, 6  ;;  %v601_v7 = vrot.slane %v536_v51, 5 }
  0x20   : > { %v356_v2 = vsel %vm355_vm7, %v354_v38, %v353_v58  ;;  %v368_v3 = vsel %vm352_vm6, %v367_v44, %v366_v59  ;;  %v547_v9 = vld [vmem:[%s3979_s6 + $0x39] sm:$0x1]  ;;  %v603_v10 = vrot.slane %v537_v52, 4  ;;  %v605_v11 = vrot.slane %v538_v55, 3  ;;  %v548_v15 = vld [vmem:[%s3979_s6 + $0x3d] sm:$0x1] }
  0x21   : > { %v370_v8 = vsel %vm355_vm7, %v369_v50, %v368_v3  ;;  %v607_v12 = vrot.slane %v539_v56, 2  ;;  %v600_v16 = vsel %vm340_vm2, %v599_v6, %v598_v1  ;;  %v609_v17 = vrot.slane %v540_v57, 1  ;;  %v289_v19 = vld [vmem:[%s3979_s6 + $0x44] sm:$0x1]  ;;  %1122 = vperm.xlu1 %3835, %v1092_v13   ;;  %v288_v24 = vld [vmem:[%s3979_s6 + $0x40] sm:$0x1] }
  0x22   : > { %v3736_v14 = vpack.c.bf16 %v370_v8, %v356_v2  ;;  %v611_v18 = vrot.slane %v542_v61, 7  ;;  %v602_v20 = vsel %vm343_vm3, %v601_v7, %v600_v16  ;;  %v613_v21 = vrot.slane %v543_v62, 6  ;;  %v1091_v25 = vld [vmem:[%s5499_s3 + $0x20] sm:$0xff]  ;;  %v290_v29 = vld [vmem:[%s3979_s6 + $0x48] sm:$0x1] }
  0x23   : > { %v615_v22 = vrot.slane %v544_v63, 5  ;;  %v617_v23 = vrot.slane %v545_v4, 4  ;;  %v604_v26 = vsel %vm346_vm4, %v603_v10, %v602_v20  ;;  %v619_v28 = vrot.slane %v546_v5, 3  ;;  %v291_v30 = vld [vmem:[%s3979_s6 + $0x4c] sm:$0x1]  ;;  %1117 = vperm.xlu0 %3834, %v1091_v25  }
  0x24   : > { %3737 = vmatprep.subr.bf16.mxu0 %v3736_v14  ;;  %v612_v27 = vsel %vm337_vm1, %v611_v18, %v541_v60  ;;  %v606_v31 = vsel %vm349_vm5, %v605_v11, %v604_v26  ;;  %v621_v33 = vrot.slane %v547_v9, 2  ;;  %v292_v34 = vld [vmem:[%s3979_s6 + $0x50] sm:$0x1]  ;;  %v293_v35 = vld [vmem:[%s3979_s6 + $0x54] sm:$0x1]  ;;  %v371_v36 = vrot.slane %v289_v19, 7 }
  0x25   : > { %v614_v32 = vsel %vm340_vm2, %v613_v21, %v612_v27  ;;  %3739 = vmatpush3.bf16.msra.mxu0 %v3736_v14  ;;  %v608_v37 = vsel %vm352_vm6, %v607_v12, %v606_v31  ;;  %v623_v39 = vrot.slane %v548_v15, 1  ;;  %v294_v40 = vld [vmem:[%s3979_s6 + $0x58] sm:$0x1]  ;;  %v295_v41 = vld [vmem:[%s3979_s6 + $0x5c] sm:$0x1]  ;;  %v373_v51 = vrot.slane %v290_v29, 6 }
  0x26   : > { %v616_v38 = vsel %vm343_vm3, %v615_v22, %v614_v32  ;;  %v610_v42 = vsel %vm355_vm7, %v609_v17, %v608_v37  ;;  %v296_v44 = vld [vmem:[%s3979_s6 + $0x60] sm:$0x1]  ;;  %v297_v45 = vld [vmem:[%s3979_s6 + $0x64] sm:$0x1]  ;;  %v298_v46 = vld [vmem:[%s3979_s6 + $0x68] sm:$0x1]  ;;  %v372_v48 = vsel %vm337_vm1, %v371_v36, %v288_v24 }
  0x27   : > { %v618_v43 = vsel %vm346_vm4, %v617_v23, %v616_v38  ;;  %v299_v47 = vld [vmem:[%s3979_s6 + $0x6c] sm:$0x1]  ;;  %v300_v50 = vld [vmem:[%s3979_s6 + $0x70] sm:$0x1]  ;;  %v375_v52 = vrot.slane %v291_v30, 5  ;;  %v377_v53 = vrot.slane %v292_v34, 4  ;;  %v374_v63 = vsel %vm340_vm2, %v373_v51, %v372_v48 }
  0x28   : > { %v620_v49 = vsel %vm349_vm5, %v619_v28, %v618_v43  ;;  %v1148_v54 = vld [vmem:[%s5500_s4 + $0x28] sm:$0xff]  ;;  %v301_v56 = vld [vmem:[%s3979_s6 + $0x74] sm:$0x1]  ;;  %v379_v57 = vrot.slane %v293_v35, 3  ;;  %v381_v58 = vrot.slane %v294_v40, 2  ;;  %v383_v59 = vrot.slane %v295_v41, 1 }
  0x29   : > { %v622_v55 = vsel %vm352_vm6, %v621_v33, %v620_v49  ;;  %1178 = vperm.xlu1 %3835, %v1148_v54   ;;  %v1147_v60 = vld [vmem:[%s5500_s4 + $0x20] sm:$0xff]  ;;  %v302_v62 = vld [vmem:[%s3979_s6 + $0x78] sm:$0x1]  ;;  %v385_v1 = vrot.slane %v297_v45, 7  ;;  %v387_v2 = vrot.slane %v298_v46, 6  ;;  %v376_v6 = vsel %vm343_vm3, %v375_v52, %v374_v63 }
  0x2a   : > { %v624_v61 = vsel %vm355_vm7, %v623_v39, %v622_v55  ;;  %v550_v3 = vld [vmem:[%s3979_s6 + $0x45] sm:$0x1]  ;;  %1173 = vperm.xlu0 %3834, %v1147_v60   ;;  %v303_v5 = vld [vmem:[%s3979_s6 + $0x7c] sm:$0x1]  ;;  %v389_v7 = vrot.slane %v299_v47, 5  ;;  %v391_v8 = vrot.slane %v300_v50, 4  ;;  %v378_v10 = vsel %vm346_vm4, %v377_v53, %v376_v6 }
  0x2b   : > { %v3744_v4 = vpack.c.bf16 %v624_v61, %v610_v42  ;;  %v549_v9 = vld [vmem:[%s3979_s6 + $0x41] sm:$0x1]  ;;  %v386_v11 = vsel %vm337_vm1, %v385_v1, %v296_v44  ;;  %v393_v12 = vrot.slane %v301_v56, 3  ;;  %v551_v13 = vld [vmem:[%s3979_s6 + $0x49] sm:$0x1]  ;;  %v380_v15 = vsel %vm349_vm5, %v379_v57, %v378_v10  ;;  %v1094_v38 = vld [vmem:[%s5499_s3 + $0x38] sm:$0xff] }
  0x2c   : > { %v552_v14 = vld [vmem:[%s3979_s6 + $0x4d] sm:$0x1]  ;;  %v388_v16 = vsel %vm340_vm2, %v387_v2, %v386_v11  ;;  %v395_v17 = vrot.slane %v302_v62, 2  ;;  %v553_v18 = vld [vmem:[%s3979_s6 + $0x51] sm:$0x1]  ;;  %v625_v20 = vrot.slane %v550_v3, 7  ;;  %v382_v21 = vsel %vm352_vm6, %v381_v58, %v380_v15 }
  0x2d   : > { %3745 = vmatprep.subr.bf16.mxu1 %v3744_v4  ;;  %v554_v19 = vld [vmem:[%s3979_s6 + $0x55] sm:$0x1]  ;;  %v390_v22 = vsel %vm343_vm3, %v389_v7, %v388_v16  ;;  %v397_v23 = vrot.slane %v303_v5, 1  ;;  %v555_v24 = vld [vmem:[%s3979_s6 + $0x59] sm:$0x1]  ;;  %v384_v26 = vsel %vm355_vm7, %v383_v59, %v382_v21  ;;  %v627_v35 = vrot.slane %v551_v13, 6  ;;  %1132 = vperm.xlu1 %3835, %v1094_v38  }
  0x2e   : > { %3747 = vmatpush3.bf16.msra.mxu1 %v3744_v4  ;;  %v556_v25 = vld [vmem:[%s3979_s6 + $0x5d] sm:$0x1]  ;;  %v392_v27 = vsel %vm346_vm4, %v391_v8, %v390_v22  ;;  %v557_v28 = vld [vmem:[%s3979_s6 + $0x61] sm:$0x1]  ;;  %v558_v29 = vld [vmem:[%s3979_s6 + $0x65] sm:$0x1]  ;;  %v626_v32 = vsel %vm337_vm1, %v625_v20, %v549_v9 }
  0x2f   : > { %v559_v30 = vld [vmem:[%s3979_s6 + $0x69] sm:$0x1]  ;;  %v560_v31 = vld [vmem:[%s3979_s6 + $0x6d] sm:$0x1]  ;;  %v394_v33 = vsel %vm349_vm5, %v393_v12, %v392_v27  ;;  %v561_v34 = vld [vmem:[%s3979_s6 + $0x71] sm:$0x1]  ;;  %v628_v47 = vsel %vm340_vm2, %v627_v35, %v626_v32 }
  0x30   : > { %v629_v36 = vrot.slane %v552_v14, 5  ;;  %v631_v37 = vrot.slane %v553_v18, 4  ;;  %v396_v39 = vsel %vm352_vm6, %v395_v17, %v394_v33  ;;  %v562_v40 = vld [vmem:[%s3979_s6 + $0x75] sm:$0x1]  ;;  %v633_v41 = vrot.slane %v554_v19, 3  ;;  %v4133_v60 = vld [vmem:[%s5497_s1 + $0x8] sm:$0xff] }
  0x31   : > { %v635_v42 = vrot.slane %v555_v24, 2  ;;  %v637_v43 = vrot.slane %v556_v25, 1  ;;  %v1093_v44 = vld [vmem:[%s5499_s3 + $0x30] sm:$0xff]  ;;  %v398_v45 = vsel %vm355_vm7, %v397_v23, %v396_v39  ;;  %v563_v46 = vld [vmem:[%s3979_s6 + $0x79] sm:$0x1]  ;;  %v639_v48 = vrot.slane %v558_v29, 7 }
  0x32   : > { %v641_v49 = vrot.slane %v559_v30, 6  ;;  %v763_v50 = vld [vmem:[%s3979_s6 + $0x6] sm:$0x1]  ;;  %1127 = vperm.xlu0 %3834, %v1093_v44   ;;  %v3740_v51 = vpack.c.bf16 %v398_v45, %v384_v26  ;;  %v564_v52 = vld [vmem:[%s3979_s6 + $0x7d] sm:$0x1]  ;;  %v630_v53 = vsel %vm343_vm3, %v629_v36, %v628_v47  ;;  %v643_v54 = vrot.slane %v560_v31, 5 }
  0x33   : > { %v645_v55 = vrot.slane %v561_v34, 4  ;;  %v762_v56 = vld [vmem:[%s3979_s6 + $0x2] sm:$0x1]  ;;  %v632_v57 = vsel %vm346_vm4, %v631_v37, %v630_v53  ;;  %v640_v58 = vsel %vm337_vm1, %v639_v48, %v557_v28  ;;  %v647_v59 = vrot.slane %v562_v40, 3  ;;  %v764_v61 = vld [vmem:[%s3979_s6 + $0xa] sm:$0x1] }
  0x34   : > { %v765_v62 = vld [vmem:[%s3979_s6 + $0xe] sm:$0x1]  ;;  %3741 = vmatprep.subr.bf16.mxu0 %v3740_v51  ;;  %v634_v63 = vsel %vm349_vm5, %v633_v41, %v632_v57  ;;  %v642_v1 = vsel %vm340_vm2, %v641_v49, %v640_v58  ;;  %v649_v2 = vrot.slane %v563_v46, 2  ;;  %v766_v3 = vld [vmem:[%s3979_s6 + $0x12] sm:$0x1]  ;;  %v826_v5 = vrot.slane %v763_v50, 7 }
  0x35   : > { %v767_v4 = vld [vmem:[%s3979_s6 + $0x16] sm:$0x1]  ;;  %v636_v6 = vsel %vm352_vm6, %v635_v42, %v634_v63  ;;  %v644_v7 = vsel %vm343_vm3, %v643_v54, %v642_v1  ;;  %v651_v8 = vrot.slane %v564_v52, 1  ;;  %3743 = vmatpush3.bf16.msra.mxu0 %v3740_v51  ;;  %v768_v9 = vld [vmem:[%s3979_s6 + $0x1a] sm:$0x1]  ;;  %v828_v21 = vrot.slane %v764_v61, 6 }
  0x36   : > { %v769_v10 = vld [vmem:[%s3979_s6 + $0x1e] sm:$0x1]  ;;  %v4148_v11 = vld [vmem:[%s5497_s1 + $0x10] sm:$0xff]  ;;  %v638_v12 = vsel %vm355_vm7, %v637_v43, %v636_v6  ;;  %v646_v13 = vsel %vm346_vm4, %v645_v55, %v644_v7  ;;  %v770_v14 = vld [vmem:[%s3979_s6 + $0x22] sm:$0x1]  ;;  %v827_v18 = vsel %vm337_vm1, %v826_v5, %v762_v56  ;;  %v830_v22 = vrot.slane %v765_v62, 5 }
  0x37   : > { %v771_v15 = vld [vmem:[%s3979_s6 + $0x26] sm:$0x1]  ;;  %v772_v16 = vld [vmem:[%s3979_s6 + $0x2a] sm:$0x1]  ;;  %v773_v17 = vld [vmem:[%s3979_s6 + $0x2e] sm:$0x1]  ;;  %v648_v19 = vsel %vm349_vm5, %v647_v59, %v646_v13  ;;  %v829_v34 = vsel %vm340_vm2, %v828_v21, %v827_v18 }
  0x38   : > { %v774_v20 = vld [vmem:[%s3979_s6 + $0x32] sm:$0x1]  ;;  %v832_v23 = vrot.slane %v766_v3, 4  ;;  %v4162_v24 = vld [vmem:[%s5497_s1 + $0x18] sm:$0xff]  ;;  %v650_v26 = vsel %vm352_vm6, %v649_v2, %v648_v19  ;;  %3601 = vmatmul.mubr.msk.f32.vlgmr.msra.gmra.mrb[0].mxu0 %vm403_vm0, %v4133_v60  ;;  %v775_v27 = vld [vmem:[%s3979_s6 + $0x36] sm:$0x1]  ;;  %v831_v40 = vsel %vm343_vm3, %v830_v22, %v829_v34 }
  0x39   : > { %v1150_v25 = vld [vmem:[%s5500_s4 + $0x38] sm:$0xff]  ;;  %v834_v28 = vrot.slane %v767_v4, 3  ;;  %v836_v29 = vrot.slane %v768_v9, 2  ;;  %v838_v30 = vrot.slane %v769_v10, 1  ;;  %v1149_v31 = vld [vmem:[%s5500_s4 + $0x30] sm:$0xff]  ;;  %v652_v32 = vsel %vm355_vm7, %v651_v8, %v650_v26  ;;  %3603 = vmatprep.mubr.msk.f32.mxu0 %vm403_vm0, %v4148_v11  ;;  %v4185_v43 = vld [vmem:[%s5497_s1 + $0x20] sm:$0xff] }
  0x3a   : > { %1188 = vperm.xlu1 %3835, %v1150_v25   ;;  %v776_v33 = vld [vmem:[%s3979_s6 + $0x3a] sm:$0x1]  ;;  %v840_v35 = vrot.slane %v771_v15, 7  ;;  %v842_v36 = vrot.slane %v772_v16, 6  ;;  %v779_v37 = vld [vmem:[%s3979_s6 + $0x46] sm:$0x1]  ;;  %1183 = vperm.xlu0 %3834, %v1149_v31   ;;  %v3748_v38 = vpack.c.bf16 %v652_v32, %v638_v12  ;;  %v833_v44 = vsel %vm346_vm4, %v832_v23, %v831_v40 }
  0x3b   : > { %v777_v39 = vld [vmem:[%s3979_s6 + $0x3e] sm:$0x1]  ;;  %v844_v41 = vrot.slane %v773_v17, 5  ;;  %v846_v42 = vrot.slane %v774_v20, 4  ;;  %v848_v46 = vrot.slane %v775_v27, 3  ;;  %v4192_v47 = vld [vmem:[%s5497_s1 + $0x28] sm:$0xff]  ;;  %v835_v50 = vsel %vm349_vm5, %v834_v28, %v833_v44 }
  0x3c   : > { %v841_v45 = vsel %vm337_vm1, %v840_v35, %v770_v14  ;;  %v778_v48 = vld [vmem:[%s3979_s6 + $0x42] sm:$0x1]  ;;  %v780_v49 = vld [vmem:[%s3979_s6 + $0x4a] sm:$0x1]  ;;  %3749 = vmatprep.subr.bf16.mxu1 %v3748_v38  ;;  %v850_v52 = vrot.slane %v776_v33, 2  ;;  %3604 = vmatmul.mubr.msk.f32.gmra.mrb[2].mxu0 %vm403_vm0, %v4162_v24  ;;  %v854_v55 = vrot.slane %v779_v37, 7  ;;  %v837_v56 = vsel %vm352_vm6, %v836_v29, %v835_v50 }
  0x3d   : > { %v843_v51 = vsel %vm340_vm2, %v842_v36, %v841_v45  ;;  %v781_v53 = vld [vmem:[%s3979_s6 + $0x4e] sm:$0x1]  ;;  %v782_v54 = vld [vmem:[%s3979_s6 + $0x52] sm:$0x1]  ;;  %3751 = vmatpush3.bf16.msra.mxu1 %v3748_v38  ;;  %v852_v58 = vrot.slane %v777_v39, 1  ;;  %3606 = vmatprep.mubr.msk.f32.mxu0 %vm403_vm0, %v4185_v43  ;;  %v839_v63 = vsel %vm355_vm7, %v838_v30, %v837_v56  ;;  %v856_v9 = vrot.slane %v780_v49, 6 }
  0x3e   : > { %v845_v57 = vsel %vm343_vm3, %v844_v41, %v843_v51  ;;  %v783_v59 = vld [vmem:[%s3979_s6 + $0x56] sm:$0x1]  ;;  %v784_v61 = vld [vmem:[%s3979_s6 + $0x5a] sm:$0x1]  ;;  %v785_v2 = vld [vmem:[%s3979_s6 + $0x5e] sm:$0x1]  ;;  %v855_v6 = vsel %vm337_vm1, %v854_v55, %v778_v48 }
  0x3f   : > { %v4211_v62 = vld [vmem:[%s5497_s1 + $0x30] sm:$0xff]  ;;  %v847_v1 = vsel %vm346_vm4, %v846_v42, %v845_v57  ;;  %v787_v3 = vld [vmem:[%s3979_s6 + $0x66] sm:$0x1]  ;;  %v788_v4 = vld [vmem:[%s3979_s6 + $0x6a] sm:$0x1]  ;;  %v858_v10 = vrot.slane %v781_v53, 5  ;;  %v857_v20 = vsel %vm340_vm2, %v856_v9, %v855_v6 }
  0x40   : > { %v789_v5 = vld [vmem:[%s3979_s6 + $0x6e] sm:$0x1]  ;;  %v849_v7 = vsel %vm349_vm5, %v848_v46, %v847_v1  ;;  %v790_v8 = vld [vmem:[%s3979_s6 + $0x72] sm:$0x1]  ;;  %v860_v12 = vrot.slane %v782_v54, 4  ;;  %3621 = vmatmul.mubr.msk.f32.vlgmr.msra.gmra.mrb[0].mxu1 %vm403_vm0, %v4133_v60  ;;  %3607 = vmatmul.mubr.msk.f32.gmra.mrb[4].mxu0 %vm403_vm0, %v4192_v47  ;;  %v862_v16 = vrot.slane %v783_v59, 3 }
  0x41   : > { %v851_v13 = vsel %vm352_vm6, %v850_v52, %v849_v7  ;;  %v786_v14 = vld [vmem:[%s3979_s6 + $0x62] sm:$0x1]  ;;  %v791_v15 = vld [vmem:[%s3979_s6 + $0x76] sm:$0x1]  ;;  %v864_v17 = vrot.slane %v784_v61, 2  ;;  %3623 = vmatprep.mubr.msk.f32.mxu1 %vm403_vm0, %v4148_v11  ;;  %v868_v21 = vrot.slane %v787_v3, 7  ;;  %3609 = vmatprep.mubr.msk.f32.mxu0 %vm403_vm0, %v4211_v62  ;;  %v859_v26 = vsel %vm343_vm3, %v858_v10, %v857_v20 }
  0x42   : > { %v853_v18 = vsel %vm355_vm7, %v852_v58, %v851_v13  ;;  %v792_v19 = vld [vmem:[%s3979_s6 + $0x7a] sm:$0x1]  ;;  %v870_v22 = vrot.slane %v788_v4, 6  ;;  %v793_v25 = vld [vmem:[%s3979_s6 + $0x7e] sm:$0x1]  ;;  %v872_v27 = vrot.slane %v789_v5, 5  ;;  %v861_v29 = vsel %vm346_vm4, %v860_v12, %v859_v26 }
  0x43   : > { %v3752_v23 = vpack.c.bf16 %v853_v18, %v839_v63  ;;  %v874_v28 = vrot.slane %v790_v8, 4  ;;  %v866_v30 = vrot.slane %v785_v2, 1  ;;  %v869_v31 = vsel %vm337_vm1, %v868_v21, %v786_v14  ;;  %v263_v33 = vld [vmem:[%s5497_s1 + $0x38] sm:$0xff] }
  0x44   : > { %v876_v32 = vrot.slane %v791_v15, 3  ;;  %3624 = vmatmul.mubr.msk.f32.gmra.mrb[2].mxu1 %vm403_vm0, %v4162_v24  ;;  %v863_v34 = vsel %vm349_vm5, %v862_v16, %v861_v29  ;;  %v871_v35 = vsel %vm340_vm2, %v870_v22, %v869_v31  ;;  %v878_v36 = vrot.slane %v792_v19, 2  ;;  %3610 = vmatmul.mubr.msk.f32.gmra.mrb[6].mxu0 %vm403_vm0, %v263_v33 }
  0x45   : > { %3753 = vmatprep.subr.bf16.mxu0 %v3752_v23  ;;  %3626 = vmatprep.mubr.msk.f32.mxu1 %vm403_vm0, %v4185_v43  ;;  %v865_v37 = vsel %vm352_vm6, %v864_v17, %v863_v34  ;;  %v873_v38 = vsel %vm343_vm3, %v872_v27, %v871_v35  ;;  %v880_v39 = vrot.slane %v793_v25, 1 }
  0x46   : > { %3755 = vmatpush3.bf16.msra.mxu0 %v3752_v23  ;;  %v875_v40 = vsel %vm346_vm4, %v874_v28, %v873_v38  ;;  %v867_v41 = vsel %vm355_vm7, %v866_v30, %v865_v37  ;;  %3640 = vmatprep.mubr.msk.f32.mxu0 %vm403_vm0, %v3961_v0  ;;  %v4280_v0 = vld [vmem:[%s5498_s2] sm:$0xff] }
  0x47   : > { %v877_v42 = vsel %vm349_vm5, %v876_v32, %v875_v40 }
  0x48   : > { %3627 = vmatmul.mubr.msk.f32.gmra.mrb[4].mxu1 %vm403_vm0, %v4192_v47  ;;  %v879_v44 = vsel %vm352_vm6, %v878_v36, %v877_v42 }
  0x49   : > { %v881_v45 = vsel %vm355_vm7, %v880_v39, %v879_v44  ;;  %3629 = vmatprep.mubr.msk.f32.mxu1 %vm403_vm0, %v4211_v62 }
  0x4a   : > { %v3756_v46 = vpack.c.bf16 %v881_v45, %v867_v41 }
  0x4c   : > { %3757 = vmatprep.subr.bf16.mxu0 %v3756_v46  ;;  %3630 = vmatmul.mubr.msk.f32.gmra.mrb[6].mxu1 %vm403_vm0, %v263_v33 }
  0x4d   : > { %3759 = vmatpush3.bf16.msra.mxu0 %v3756_v46  ;;  %3668 = vmatprep.mubr.msk.f32.mxu1 %vm1255_vm8, %v4280_v0 }
  0x50   : > { %3641 = vmatmul.mubr.msk.f32.vlgmr.msra.gmra.mrb[8].mxu0 %vm403_vm0, %v4133_v60 }
  0x51   : > { %3643 = vmatprep.mubr.msk.f32.mxu0 %vm403_vm0, %v4148_v11 }
  0x54   : > { %3644 = vmatmul.mubr.msk.f32.gmra.mrb[10].mxu0 %vm403_vm0, %v4162_v24 }
  0x55   : > { %3646 = vmatprep.mubr.msk.f32.mxu0 %vm403_vm0, %v4185_v43 }
  0x58   : > { %3647 = vmatmul.mubr.msk.f32.gmra.mrb[12].mxu0 %vm403_vm0, %v4192_v47 }
  0x59   : > { %3649 = vmatprep.mubr.msk.f32.mxu0 %vm403_vm0, %v4211_v62 }
  0x5c   : > { %3650 = vmatmul.mubr.msk.f32.gmra.mrb[14].mxu0 %vm403_vm0, %v263_v33 }
  0x5d   : > { %3696 = vmatprep.mubr.msk.f32.mxu0 %vm1255_vm8, %v4280_v0 }
  0x90   : > { %v4336_v10 = vpop.permute.xlu1 %1153  ;;  %v4360_v28 = vpop.permute.xlu0 %1097 }
  0x94   : > { %v4352_v22 = vpop.permute.xlu1 %1158  ;;  %v1103_v37 = vpop.permute.xlu0 %1102 }
  0x98   : > { %v4368_v34 = vpop.permute.xlu1 %1112 }
  0x9c   : > { %v4384_v45 = vpop.permute.xlu1 %1168 }
 0x10b   : > { %v4286_v60 = vpop.f32.mrb[0].mxu0 }
 0x10c   : > { %v4288_v11 = vpop.f32.mrb[1].mxu0  ;;  %v992_v47 = vmul.f32 %v4286_v60, %v4286_v60 }
 0x10d   : > { %v991_v49 = vmul.f32 %v4288_v11, %v4288_v11 }
 0x10f   : > { %v4290_v24 = vpop.f32.mrb[2].mxu0 }
 0x110   : > { %v4292_v43 = vpop.f32.mrb[3].mxu0  ;;  %v994_v56 = vmul.f32 %v4290_v24, %v4290_v24 }
 0x111   : > { %v993_v59 = vmul.f32 %v4292_v43, %v4292_v43 }
 0x113   : > { %v4296_v48 = vpop.f32.mrb[0].mxu1  ;;  %v4300_v50 = vpop.f32.mrb[4].mxu0 }
 0x114   : > { %v1000_v51 = vmul.f32 %v4296_v48, %v4296_v48  ;;  %v4304_v52 = vpop.f32.mrb[1].mxu1  ;;  %v4306_v53 = vpop.f32.mrb[5].mxu0  ;;  %v996_v3 = vmul.f32 %v4300_v50, %v4300_v50 }
 0x115   : > { %v999_v54 = vmul.f32 %v4304_v52, %v4304_v52  ;;  %v995_v7 = vmul.f32 %v4306_v53, %v4306_v53 }
 0x116   : > { %v1008_v55 = vadd.f32 %v1000_v51, %v992_v47 }
 0x117   : > { %v1007_v57 = vadd.f32 %v999_v54, %v991_v49  ;;  %v4312_v58 = vpop.f32.mrb[2].mxu1  ;;  %v4322_v1 = vpop.f32.mrb[6].mxu0 }
 0x118   : > { %v1002_v61 = vmul.f32 %v4312_v58, %v4312_v58  ;;  %v4318_v62 = vpop.f32.mrb[3].mxu1  ;;  %v4326_v4 = vpop.f32.mrb[7].mxu0  ;;  %v998_v14 = vmul.f32 %v4322_v1, %v4322_v1 }
 0x119   : > { %v1001_v63 = vmul.f32 %v4318_v62, %v4318_v62  ;;  %v997_v17 = vmul.f32 %v4326_v4, %v4326_v4 }
 0x11a   : > { %v1010_v2 = vadd.f32 %v1002_v61, %v994_v56 }
 0x11b   : > { %v1009_v5 = vadd.f32 %v1001_v63, %v993_v59  ;;  %v4328_v6 = vpop.f32.mrb[4].mxu1 }
 0x11c   : > { %v1004_v8 = vmul.f32 %v4328_v6, %v4328_v6  ;;  %v4334_v9 = vpop.f32.mrb[5].mxu1 }
 0x11d   : > { %v1003_v12 = vmul.f32 %v4334_v9, %v4334_v9 }
 0x11e   : > { %v1012_v13 = vadd.f32 %v1004_v8, %v996_v3 }
 0x11f   : > { %v1011_v15 = vadd.f32 %v1003_v12, %v995_v7  ;;  %v4342_v16 = vpop.f32.mrb[6].mxu1  ;;  %v1123_v12 = vpop.permute.xlu1 %1122 }
 0x120   : > { %v1006_v18 = vmul.f32 %v4342_v16, %v4342_v16  ;;  %v4348_v19 = vpop.f32.mrb[7].mxu1 }
 0x121   : > { %v1005_v20 = vmul.f32 %v4348_v19, %v4348_v19 }
 0x122   : > { %v1014_v21 = vadd.f32 %v1006_v18, %v998_v14 }
 0x123   : > { %v1013_v23 = vadd.f32 %v1005_v20, %v997_v17  ;;  %v4354_v25 = vpop.f32.mrb[8].mxu0 }
 0x124   : > { %v1016_v26 = vmul.f32 %v4354_v25, %v4354_v25  ;;  %v4358_v27 = vpop.f32.mrb[9].mxu0 }
 0x125   : > { %v1015_v29 = vmul.f32 %v4358_v27, %v4358_v27 }
 0x126   : > { %v1024_v30 = vadd.f32 %v1016_v26, %v1008_v55  ;;  %v4397_v55 = vpop.permute.xlu0 %1107 }
 0x127   : > { %v1023_v31 = vadd.f32 %v1015_v29, %v1007_v57  ;;  %v4364_v32 = vpop.f32.mrb[10].mxu0 }
 0x128   : > { %3836 = vrsqrt.f32 %v1024_v30  ;;  %v4366_v33 = vpop.f32.mrb[11].mxu0  ;;  %v1018_v35 = vmul.f32 %v4364_v32, %v4364_v32  ;;  %vm1040_vm9 = vcmp.eq.f32.partialorder %v1024_v30, inf  ;;  %v1043_v63 = vand.u32 2147483648, %v1024_v30 }
 0x129   : > { %3838 = vrsqrt.f32 %v1023_v31  ;;  %v1017_v36 = vmul.f32 %v4366_v33, %v4366_v33  ;;  %vm1042_vm10 = vcmp.eq.f32.partialorder %v1024_v30, 0.0  ;;  %vm1033_vm11 = vcmp.eq.f32.partialorder %v1023_v31, inf }
 0x12a   : > { %v1026_v39 = vadd.f32 %v1018_v35, %v1010_v2  ;;  %v1036_v8 = vand.u32 2147483648, %v1023_v31  ;;  %vm1035_vm12 = vcmp.eq.f32.partialorder %v1023_v31, 0.0 }
 0x12b   : > { %v4374_v38 = vpop.f32.mrb[12].mxu0  ;;  %v4376_v40 = vadd.f32 %v1017_v36, %v1009_v5 }
 0x12c   : > { %v1020_v41 = vmul.f32 %v4374_v38, %v4374_v38  ;;  %v4380_v42 = vpop.f32.mrb[13].mxu0  ;;  %3840 = vrsqrt.f32 %v1026_v39  ;;  %vm1054_vm13 = vcmp.eq.f32.partialorder %v1026_v39, inf  ;;  %vm1056_vm14 = vcmp.eq.f32.partialorder %v1026_v39, 0.0 }
 0x12d   : > { %v1019_v44 = vmul.f32 %v4380_v42, %v4380_v42  ;;  %3842 = vrsqrt.f32 %v4376_v40  ;;  %v1057_v20 = vand.u32 2147483648, %v1026_v39  ;;  %vm1047_vm15 = vcmp.eq.f32.partialorder %v4376_v40, inf }
 0x12e   : > { %v4389_v47 = vadd.f32 %v1020_v41, %v1012_v13  ;;  %vm1049_vm0 = vcmp.eq.f32.partialorder %v4376_v40, 0.0  ;;  %v1050_v26 = vand.u32 2147483648, %v4376_v40  ;;  %v1179_v41 = vpop.permute.xlu1 %1178 }
 0x12f   : > { %v4387_v46 = vpop.f32.mrb[14].mxu0  ;;  %v4391_v49 = vadd.f32 %v1019_v44, %v1011_v15  ;;  %v4408_v15 = vpop.permute.xlu0 %1163 }
 0x130   : > { %v1022_v51 = vmul.f32 %v4387_v46, %v4387_v46  ;;  %v4395_v54 = vpop.f32.mrb[15].mxu0  ;;  %3844 = vrsqrt.f32 %v4389_v47  ;;  %vm1068_vm1 = vcmp.eq.f32.partialorder %v4389_v47, inf  ;;  %vm1070_vm2 = vcmp.eq.f32.partialorder %v4389_v47, 0.0 }
 0x131   : > { %v1021_v56 = vmul.f32 %v4395_v54, %v4395_v54  ;;  %3846 = vrsqrt.f32 %v4391_v49  ;;  %vm1061_vm3 = vcmp.eq.f32.partialorder %v4391_v49, inf  ;;  %vm1063_vm4 = vcmp.eq.f32.partialorder %v4391_v49, 0.0 }
 0x132   : > { %v3837_v57 = vpop.eup %3836  ;;  %v4403_v3 = vadd.f32 %v1022_v51, %v1014_v21 }
 0x133   : > { %v3839_v59 = vpop.eup %3838  ;;  %v1039_v61 = vmul.f32 %v3837_v57, %v1024_v30  ;;  %v4405_v5 = vadd.f32 %v1021_v56, %v1013_v23  ;;  %v1064_v57 = vand.u32 2147483648, %v4391_v49 }
 0x134   : > { %v1032_v2 = vmul.f32 %v3839_v59, %v1023_v31  ;;  %3848 = vrsqrt.f32 %v4403_v3  ;;  %vm1082_vm5 = vcmp.eq.f32.partialorder %v4403_v3, inf  ;;  %vm1084_vm6 = vcmp.eq.f32.partialorder %v4403_v3, 0.0 }
 0x135   : > { %v1041_v7 = vsel %vm1040_vm9, %v1024_v30, %v1039_v61  ;;  %v1071_v30 = vand.u32 2147483648, %v4389_v47  ;;  %vm1075_vm7 = vcmp.eq.f32.partialorder %v4405_v5, inf  ;;  %vm1077_vm9 = vcmp.eq.f32.partialorder %v4405_v5, 0.0 }
 0x136   : > { %v1044_v13 = vsel %vm1042_vm10, %v1043_v63, %v1041_v7  ;;  %v1034_v14 = vsel %vm1033_vm11, %v1023_v31, %v1032_v2  ;;  %v3841_v18 = vpop.eup %3840  ;;  %v1085_v63 = vand.u32 2147483648, %v4403_v3 }
 0x137   : > { %3850 = vrcp.f32 %v1044_v13  ;;  %v1037_v17 = vsel %vm1035_vm12, %v1036_v8, %v1034_v14  ;;  %v3843_v21 = vpop.eup %3842  ;;  %v1053_v23 = vmul.f32 %v3841_v18, %v1026_v39  ;;  %v1136_v31 = vmul.f32 %v1103_v37, %v1044_v13  ;;  %v1118_v37 = vpop.permute.xlu0 %1117 }
 0x138   : > { %3852 = vrcp.f32 %v1037_v17  ;;  %v1046_v29 = vmul.f32 %v3843_v21, %v4376_v40  ;;  %v1135_v35 = vmul.f32 %v4360_v28, %v1037_v17  ;;  %v1133_v21 = vpop.permute.xlu1 %1132 }
 0x139   : > { %3854 = vrsqrt.f32 %v4405_v5  ;;  %v1055_v36 = vsel %vm1054_vm13, %v1026_v39, %v1053_v23  ;;  %v1192_v2 = vadd.f32 %v4352_v22, %v1136_v31  ;;  %v1078_v22 = vand.u32 2147483648, %v4405_v5 }
 0x13a   : > { %v3845_v44 = vpop.eup %3844  ;;  %v1058_v51 = vsel %vm1056_vm14, %v1057_v20, %v1055_v36  ;;  %v1048_v56 = vsel %vm1047_vm15, %v4376_v40, %v1046_v29  ;;  %v1191_v7 = vadd.f32 %v4336_v10, %v1135_v35 }
 0x13b   : > { %v3847_v59 = vpop.eup %3846  ;;  %3856 = vrcp.f32 %v1058_v51  ;;  %v1051_v28 = vsel %vm1049_vm0, %v1050_v26, %v1048_v56  ;;  %v1067_v61 = vmul.f32 %v3845_v44, %v4389_v47  ;;  %v1138_v13 = vmul.f32 %v4368_v34, %v1058_v51  ;;  %v1174_v35 = vpop.permute.xlu0 %1173 }
 0x13c   : > { %3858 = vrcp.f32 %v1051_v28  ;;  %v1060_v39 = vmul.f32 %v3847_v59, %v4391_v49  ;;  %v1137_v10 = vmul.f32 %v4397_v55, %v1051_v28 }
 0x13d   : > { %v1069_v40 = vsel %vm1068_vm1, %v4389_v47, %v1067_v61  ;;  %v1194_v51 = vadd.f32 %v4384_v45, %v1138_v13 }
 0x13e   : > { %v3849_v8 = vpop.eup %3848  ;;  %v1072_v14 = vsel %vm1070_vm2, %v1071_v30, %v1069_v40  ;;  %v1062_v17 = vsel %vm1061_vm3, %v4391_v49, %v1060_v39 }
 0x13f   : > { %3860 = vrcp.f32 %v1072_v14  ;;  %v1065_v20 = vsel %vm1063_vm4, %v1064_v57, %v1062_v17  ;;  %v1081_v23 = vmul.f32 %v3849_v8, %v4403_v3  ;;  %v1140_v26 = vmul.f32 %v1123_v12, %v1072_v14 }
 0x140   : > { %3862 = vrcp.f32 %v1065_v20  ;;  %v1139_v36 = vmul.f32 %v1118_v37, %v1065_v20  ;;  %v1193_v37 = vadd.f32 %v4408_v15, %v1137_v10 }
 0x141   : > { %v3851_v18 = vpop.eup %3850  ;;  %v1083_v49 = vsel %vm1082_vm5, %v4403_v3, %v1081_v23  ;;  %v1196_v28 = vadd.f32 %v1179_v41, %v1140_v26 }
 0x142   : > { %v3853_v34 = vpop.eup %3852  ;;  %v1240_v47 = vmul.f32 %v3851_v18, %v4354_v25  ;;  %v1202_v29 = vmul.f32 %v3851_v18, %v4286_v60  ;;  %v1086_v25 = vsel %vm1084_vm6, %v1085_v63, %v1083_v49  ;;  %v1224_v45 = vmul.f32 %v3851_v18, %v4296_v48  ;;  %v1189_v63 = vpop.permute.xlu1 %1188 }
 0x143   : > { %v3855_v30 = vpop.eup %3854  ;;  %v1239_v31 = vmul.f32 %v3853_v34, %v4358_v27  ;;  %v1200_v55 = vmul.f32 %v3853_v34, %v4288_v11  ;;  %3864 = vrcp.f32 %v1086_v25  ;;  %v1142_v27 = vmul.f32 %v1133_v21, %v1086_v25  ;;  %v1128_v48 = vpop.permute.xlu0 %1127 }
 0x144   : > { %v4459_v44 = vmul.f32 %v1240_v47, %v1192_v2  ;;  %v1074_v60 = vmul.f32 %v3855_v30, %v4405_v5  ;;  %v4472_v11 = vmul.f32 %v1202_v29, %v1192_v2  ;;  %v1223_v59 = vmul.f32 %v3853_v34, %v4304_v52 }
 0x145   : > { %v4465_v12 = vmul.f32 %v1239_v31, %v1191_v7  ;;  %v4467_v56 = vmul.f32 %v1200_v55, %v1191_v7  ;;  %v3857_v3 = vpop.eup %3856  ;;  %v1195_v61 = vadd.f32 %v1174_v35, %v1139_v36  ;;  %v1198_v13 = vadd.f32 %v1189_v63, %v1142_v27  ;;  %v266_v63 = vld [vmem:[%s5498_s2 + $0x10] sm:$0xff] }
 0x146   : > { %v1076_v57 = vsel %vm1075_vm7, %v4405_v5, %v1074_v60  ;;  %v3859_v40 = vpop.eup %3858  ;;  %v1242_v8 = vmul.f32 %v3857_v3, %v4364_v32  ;;  %v4483_v17 = vmul.f32 %v1223_v59, %v1191_v7  ;;  %v4485_v15 = vmul.f32 %v1224_v45, %v1192_v2 }
 0x147   : > { %v1079_v39 = vsel %vm1077_vm9, %v1078_v22, %v1076_v57  ;;  %v3760_v14 = vpack.c.bf16 %v4472_v11, %v4467_v56  ;;  %v1241_v52 = vmul.f32 %v3859_v40, %v4366_v33  ;;  %v1204_v41 = vmul.f32 %v3859_v40, %v4292_v43 }
 0x148   : > { %3866 = vrcp.f32 %v1079_v39  ;;  %v4488_v5 = vmul.f32 %v1242_v8, %v1194_v51  ;;  %v1141_v22 = vmul.f32 %v1128_v48, %v1079_v39  ;;  %v1206_v32 = vmul.f32 %v3857_v3, %v4290_v24  ;;  %v267_v8 = vld [vmem:[%s5498_s2 + $0x18] sm:$0xff]  ;;  %v270_v48 = vld [vmem:[%s5498_s2 + $0x30] sm:$0xff] }
 0x149   : > { %3761 = vmatprep.subr.bf16.mxu1 %v3760_v14  ;;  %v1225_v18 = vmul.f32 %v3859_v40, %v4318_v62  ;;  %v3861_v10 = vpop.eup %3860  ;;  %v4492_v20 = vmul.f32 %v1241_v52, %v1193_v37  ;;  %v3776_v33 = vpack.c.bf16 %v4485_v15, %v4483_v17  ;;  %v4496_v7 = vmul.f32 %v1204_v41, %v1193_v37  ;;  %v269_v52 = vld [vmem:[%s5498_s2 + $0x28] sm:$0xff] }
 0x14a   : > { %3763 = vmatpush3.bf16.msra.mxu1 %v3760_v14  ;;  %v1226_v2 = vmul.f32 %v3857_v3, %v4312_v58  ;;  %v3863_v43 = vpop.eup %3862  ;;  %v1244_v21 = vmul.f32 %v3861_v10, %v4374_v38  ;;  %v4500_v23 = vmul.f32 %v1206_v32, %v1194_v51  ;;  %v1210_v24 = vmul.f32 %v3861_v10, %v4300_v50 }
 0x14b   : > { %v4502_v34 = vmul.f32 %v1225_v18, %v1193_v37  ;;  %v1243_v62 = vmul.f32 %v3863_v43, %v4380_v42  ;;  %3777 = vmatprep.subr.bf16.mxu0 %v3776_v33  ;;  %v1208_v26 = vmul.f32 %v3863_v43, %v4306_v53  ;;  %v1227_v29 = vmul.f32 %v3863_v43, %v4334_v9 }
 0x14c   : > { %v4506_v47 = vmul.f32 %v1226_v2, %v1194_v51  ;;  %v4510_v30 = vmul.f32 %v1244_v21, %v1196_v28  ;;  %3779 = vmatpush3.bf16.msra.mxu0 %v3776_v33  ;;  %v3764_v58 = vpack.c.bf16 %v4500_v23, %v4496_v7  ;;  %v4514_v38 = vmul.f32 %v1210_v24, %v1196_v28 }
 0x14d   : > { %v1228_v31 = vmul.f32 %v3861_v10, %v4328_v6  ;;  %v3865_v50 = vpop.eup %3864  ;;  %v4517_v35 = vmul.f32 %v1243_v62, %v1195_v61  ;;  %v4521_v36 = vmul.f32 %v1208_v26, %v1195_v61  ;;  %v4523_v53 = vmul.f32 %v1227_v29, %v1195_v61 }
 0x14e   : > { %v3780_v42 = vpack.c.bf16 %v4506_v47, %v4502_v34  ;;  %v1246_v9 = vmul.f32 %v3865_v50, %v4387_v46  ;;  %v1214_v49 = vmul.f32 %v3865_v50, %v4322_v1  ;;  %v1230_v55 = vmul.f32 %v3865_v50, %v4342_v16  ;;  %3765 = vmatprep.subr.bf16.mxu1 %v3764_v58  ;;  %v1184_v46 = vpop.permute.xlu0 %1183 }
 0x14f   : > { %5523 = vst [vmem:[#allocation2_spill] sm:$0xff] %v4517_v35  ;;  %5524 = vst [vmem:[#allocation3_spill] sm:$0xff] %v4521_v36  ;;  %v4528_v51 = vmul.f32 %v1228_v31, %v1196_v28  ;;  %3767 = vmatpush3.bf16.msra.mxu1 %v3764_v58  ;;  %v3768_v6 = vpack.c.bf16 %v4514_v38, %v4521_v36  ;;  %v1197_v59 = vadd.f32 %v1184_v46, %v1141_v22  ;;  %v271_v22 = vld [vmem:[%s5498_s2 + $0x38] sm:$0xff] }
 0x150   : > { %5525 = vst [vmem:[#allocation4_spill] sm:$0xff] %v4523_v53  ;;  %3781 = vmatprep.subr.bf16.mxu0 %v3780_v42  ;;  %v4532_v60 = vmul.f32 %v1214_v49, %v1198_v13  ;;  %v4534_v27 = vmul.f32 %v1230_v55, %v1198_v13  ;;  %v4536_v57 = vmul.f32 %v1246_v9, %v1198_v13  ;;  %v268_v13 = vld [vmem:[%s5498_s2 + $0x20] sm:$0xff] }
 0x151   : > { %3783 = vmatpush3.bf16.msra.mxu0 %v3780_v42  ;;  %v3784_v1 = vpack.c.bf16 %v4528_v51, %v4523_v53  ;;  %3769 = vmatprep.subr.bf16.mxu1 %v3768_v6  ;;  %v3796_v40 = vpack.c.bf16 %v4488_v5, %v4492_v20  ;;  %v3800_v14 = vpack.c.bf16 %v4510_v30, %v4517_v35 }
 0x152   : > { %v3867_v25 = vpop.eup %3866  ;;  %5526 = vst [vmem:[#allocation5_spill] sm:$0xff] %v4532_v60  ;;  %5527 = vst [vmem:[#allocation6_spill] sm:$0xff] %v4534_v27 }
 0x153   : > { %v1245_v16 = vmul.f32 %v3867_v25, %v4395_v54  ;;  %v1212_v45 = vmul.f32 %v3867_v25, %v4326_v4  ;;  %v1229_v3 = vmul.f32 %v3867_v25, %v4348_v19  ;;  %3785 = vmatprep.subr.bf16.mxu0 %v3784_v1  ;;  %3771 = vmatpush3.bf16.msra.mxu1 %v3768_v6  ;;  %v265_v19 = vld [vmem:[%s5498_s2 + $0x8] sm:$0xff] }
 0x154   : > { %v3792_v4 = vpack.c.bf16 %v4459_v44, %v4465_v12 }
 0x155   : > { %v4543_v37 = vmul.f32 %v1212_v45, %v1197_v59  ;;  %v4545_v28 = vmul.f32 %v1229_v3, %v1197_v59  ;;  %v4547_v61 = vmul.f32 %v1245_v16, %v1197_v59  ;;  %3787 = vmatpush3.bf16.msra.mxu0 %v3784_v1 }
 0x157   : > { %5528 = vst [vmem:[#allocation7_spill] sm:$0xff] %v4543_v37  ;;  %5529 = vst [vmem:[#allocation8_spill] sm:$0xff] %v4545_v28  ;;  %v3772_v39 = vpack.c.bf16 %v4532_v60, %v4543_v37  ;;  %v3788_v54 = vpack.c.bf16 %v4534_v27, %v4545_v28  ;;  %v3804_v41 = vpack.c.bf16 %v4536_v57, %v4547_v61 }
 0x158   : > { %5530 = vst [vmem:[#allocation9_spill] sm:$0xff] %v4547_v61 }
 0x159   : > { %3773 = vmatprep.subr.bf16.mxu1 %v3772_v39  ;;  %3789 = vmatprep.subr.bf16.mxu0 %v3788_v54 }
 0x15a   : > { %3775 = vmatpush3.bf16.msra.mxu1 %v3772_v39  ;;  %3791 = vmatpush3.bf16.msra.mxu0 %v3788_v54 }
 0x15b   : > { %3793 = vmatprep.subr.bf16.mxu1 %v3792_v4 }
 0x15d   : > { %3669 = vmatmul.mubr.msk.f32.vlgmr.msra.gmra.mrb[8].mxu1 %vm1255_vm8, %v265_v19  ;;  %3697 = vmatmul.mubr.msk.f32.vlgmr.msra.gmra.mrb[16].mxu0 %vm1255_vm8, %v265_v19 }
 0x15e   : > { %3795 = vmatpush3.bf16.msra.mxu1 %v3792_v4  ;;  %3671 = vmatprep.mubr.msk.f32.mxu1 %vm1255_vm8, %v266_v63 }
 0x15f   : > { %3797 = vmatprep.subr.bf16.mxu1 %v3796_v40  ;;  %3699 = vmatprep.mubr.msk.f32.mxu0 %vm1255_vm8, %v266_v63 }
 0x161   : > { %3672 = vmatmul.mubr.msk.f32.gmra.mrb[10].mxu1 %vm1255_vm8, %v267_v8  ;;  %3700 = vmatmul.mubr.msk.f32.gmra.mrb[18].mxu0 %vm1255_vm8, %v267_v8 }
 0x162   : > { %3799 = vmatpush3.bf16.msra.mxu1 %v3796_v40  ;;  %3674 = vmatprep.mubr.msk.f32.mxu1 %vm1255_vm8, %v268_v13 }
 0x163   : > { %3801 = vmatprep.subr.bf16.mxu1 %v3800_v14  ;;  %3702 = vmatprep.mubr.msk.f32.mxu0 %vm1255_vm8, %v268_v13 }
 0x165   : > { %3675 = vmatmul.mubr.msk.f32.gmra.mrb[12].mxu1 %vm1255_vm8, %v269_v52  ;;  %3703 = vmatmul.mubr.msk.f32.gmra.mrb[20].mxu0 %vm1255_vm8, %v269_v52 }
 0x166   : > { %3803 = vmatpush3.bf16.msra.mxu1 %v3800_v14  ;;  %3677 = vmatprep.mubr.msk.f32.mxu1 %vm1255_vm8, %v270_v48 }
 0x167   : > { %3805 = vmatprep.subr.bf16.mxu1 %v3804_v41  ;;  %3705 = vmatprep.mubr.msk.f32.mxu0 %vm1255_vm8, %v270_v48 }
 0x169   : > { %3678 = vmatmul.mubr.msk.f32.gmra.mrb[14].mxu1 %vm1255_vm8, %v271_v22  ;;  %3706 = vmatmul.mubr.msk.f32.gmra.mrb[22].mxu0 %vm1255_vm8, %v271_v22 }
 0x16a   : > { %3807 = vmatpush3.bf16.msra.mxu1 %v3804_v41  ;;  %3724 = vmatprep.mubr.msk.f32.mxu1 %vm1255_vm8, %v4280_v0 }
 0x16d   : > { %3725 = vmatmul.mubr.msk.f32.vlgmr.msra.gmra.mrb[16].mxu1 %vm1255_vm8, %v265_v19 }
 0x16e   : > { %3727 = vmatprep.mubr.msk.f32.mxu1 %vm1255_vm8, %v266_v63 }
 0x171   : > { %3728 = vmatmul.mubr.msk.f32.gmra.mrb[18].mxu1 %vm1255_vm8, %v267_v8 }
 0x172   : > { %3730 = vmatprep.mubr.msk.f32.mxu1 %vm1255_vm8, %v268_v13 }
 0x175   : > { %3731 = vmatmul.mubr.msk.f32.gmra.mrb[20].mxu1 %vm1255_vm8, %v269_v52 }
 0x176   : > { %3733 = vmatprep.mubr.msk.f32.mxu1 %vm1255_vm8, %v270_v48 }
 0x179   : > { %3734 = vmatmul.mubr.msk.f32.gmra.mrb[22].mxu1 %vm1255_vm8, %v271_v22  ;;  %vm2195_vm8 = vcmask 122880  }
 0x230   : > { %v4605_v32 = vpop.f32.mrb[8].mxu1  ;;  %v4607_v18 = vpop.f32.mrb[16].mxu0 }
 0x231   : > { %v1596_v0 = vmul.f32 %v4605_v32, %v4472_v11  ;;  %v1636_v10 = vmul.f32 %v4605_v32, %v4605_v32  ;;  %v1604_v33 = vmul.f32 %v4607_v18, %v4485_v15  ;;  %v1644_v2 = vmul.f32 %v4607_v18, %v4607_v18  ;;  %v4617_v43 = vpop.f32.mrb[9].mxu1  ;;  %v4619_v21 = vpop.f32.mrb[17].mxu0 }
 0x232   : > { %v1595_v24 = vmul.f32 %v4617_v43, %v4467_v56  ;;  %v1635_v62 = vmul.f32 %v4617_v43, %v4617_v43  ;;  %v1603_v26 = vmul.f32 %v4619_v21, %v4483_v17  ;;  %v1643_v29 = vmul.f32 %v4619_v21, %v4619_v21 }
 0x233   : > { %v1612_v58 = vadd.f32 %v1604_v33, %v1596_v0  ;;  %v1652_v31 = vadd.f32 %v1644_v2, %v1636_v10 }
 0x234   : > { %v1611_v50 = vadd.f32 %v1603_v26, %v1595_v24  ;;  %v1651_v42 = vadd.f32 %v1643_v29, %v1635_v62  ;;  %v4629_v9 = vpop.f32.mrb[10].mxu1  ;;  %v4631_v49 = vpop.f32.mrb[18].mxu0 }
 0x235   : > { %v1598_v55 = vmul.f32 %v4629_v9, %v4500_v23  ;;  %v1638_v6 = vmul.f32 %v4629_v9, %v4629_v9  ;;  %v1606_v25 = vmul.f32 %v4631_v49, %v4506_v47  ;;  %v1646_v46 = vmul.f32 %v4631_v49, %v4631_v49  ;;  %v4641_v1 = vpop.f32.mrb[11].mxu1  ;;  %v4643_v16 = vpop.f32.mrb[19].mxu0 }
 0x236   : > { %v1597_v59 = vmul.f32 %v4641_v1, %v4496_v7  ;;  %v1637_v45 = vmul.f32 %v4641_v1, %v4641_v1  ;;  %v1605_v3 = vmul.f32 %v4643_v16, %v4502_v34  ;;  %v1645_v39 = vmul.f32 %v4643_v16, %v4643_v16 }
 0x237   : > { %v1614_v54 = vadd.f32 %v1606_v25, %v1598_v55  ;;  %v1654_v4 = vadd.f32 %v1646_v46, %v1638_v6 }
 0x238   : > { %v1613_v19 = vadd.f32 %v1605_v3, %v1597_v59  ;;  %v1653_v63 = vadd.f32 %v1645_v39, %v1637_v45  ;;  %v4653_v40 = vpop.f32.mrb[12].mxu1  ;;  %v4655_v8 = vpop.f32.mrb[20].mxu0 }
 0x239   : > { %v1600_v13 = vmul.f32 %v4653_v40, %v4514_v38  ;;  %v1640_v14 = vmul.f32 %v4653_v40, %v4653_v40  ;;  %v1608_v52 = vmul.f32 %v4655_v8, %v4528_v51  ;;  %v1648_v48 = vmul.f32 %v4655_v8, %v4655_v8  ;;  %v4665_v41 = vpop.f32.mrb[13].mxu1  ;;  %v4667_v22 = vpop.f32.mrb[21].mxu0 }
 0x23a   : > { %5531 = vst [vmem:[#allocation10_spill] sm:$0xff] %v4667_v22  ;;  %v1599_v0 = vmul.f32 %v4665_v41, %v4521_v36  ;;  %v1639_v10 = vmul.f32 %v4665_v41, %v4665_v41  ;;  %v1607_v33 = vmul.f32 %v4667_v22, %v4523_v53  ;;  %v1647_v2 = vmul.f32 %v4667_v22, %v4667_v22 }
 0x23b   : > { %v1616_v24 = vadd.f32 %v1608_v52, %v1600_v13  ;;  %v1656_v62 = vadd.f32 %v1648_v48, %v1640_v14  ;;  %v1743_v53 = vlaneseq }
 0x23c   : > { %v1615_v26 = vadd.f32 %v1607_v33, %v1599_v0  ;;  %v1655_v29 = vadd.f32 %v1647_v2, %v1639_v10  ;;  %v4677_v55 = vpop.f32.mrb[14].mxu1  ;;  %v4679_v6 = vpop.f32.mrb[22].mxu0 }
 0x23d   : > { %5532 = vst [vmem:[#allocation11_spill] sm:$0xff] %v4677_v55  ;;  %5533 = vst [vmem:[#allocation12_spill] sm:$0xff] %v4679_v6  ;;  %v1602_v25 = vmul.f32 %v4677_v55, %v4532_v60  ;;  %v1642_v46 = vmul.f32 %v4677_v55, %v4677_v55  ;;  %v1610_v59 = vmul.f32 %v4679_v6, %v4534_v27  ;;  %v4689_v3 = vpop.f32.mrb[15].mxu1  ;;  %v4691_v39 = vpop.f32.mrb[23].mxu0 }
 0x23e   : > { %v1650_v45 = vmul.f32 %v4679_v6, %v4679_v6  ;;  %5534 = vst [vmem:[#allocation13_spill] sm:$0xff] %v4689_v3  ;;  %5535 = vst [vmem:[#allocation14_spill] sm:$0xff] %v4691_v39  ;;  %v1601_v13 = vmul.f32 %v4689_v3, %v4543_v37  ;;  %v1641_v14 = vmul.f32 %v4689_v3, %v4689_v3 }
 0x23f   : > { %v1609_v52 = vmul.f32 %v4691_v39, %v4545_v28  ;;  %v1649_v48 = vmul.f32 %v4691_v39, %v4691_v39  ;;  %v1618_v0 = vadd.f32 %v1610_v59, %v1602_v25 }
 0x240   : > { %v1658_v10 = vadd.f32 %v1650_v45, %v1642_v46  ;;  %v4701_v27 = vpop.f32.mrb[16].mxu1 }
 0x241   : > { %v1617_v33 = vadd.f32 %v1609_v52, %v1601_v13  ;;  %v1657_v2 = vadd.f32 %v1649_v48, %v1641_v14  ;;  %v1620_v60 = vmul.f32 %v4701_v27, %v4459_v44  ;;  %v1660_v37 = vmul.f32 %v4701_v27, %v4701_v27  ;;  %v4707_v6 = vpop.f32.mrb[17].mxu1 }
 0x242   : > { %v1619_v28 = vmul.f32 %v4707_v6, %v4465_v12  ;;  %v1659_v39 = vmul.f32 %v4707_v6, %v4707_v6 }
 0x243   : > { %v4713_v25 = vadd.f32 %v1620_v60, %v1612_v58  ;;  %v1668_v46 = vadd.f32 %v1660_v37, %v1652_v31  ;;  %v3909_v31 = vmov 1966171168  }
 0x244   : > { %v4715_v59 = vadd.f32 %v1619_v28, %v1611_v50  ;;  %v1667_v45 = vadd.f32 %v1659_v39, %v1651_v42  ;;  %v4717_v13 = vpop.f32.mrb[18].mxu1  ;;  %v1741_v50 = vunpack.c.l.s4 %v3909_v31 }
 0x245   : > { %v1676_v14 = vadd.f32 1e-06, %v1668_v46  ;;  %v1622_v52 = vmul.f32 %v4717_v13, %v4488_v5  ;;  %v1662_v48 = vmul.f32 %v4717_v13, %v4717_v13  ;;  %v4723_v3 = vpop.f32.mrb[19].mxu1  ;;  %vm1700_vm10 = vcmp.ge.f32.partialorder %v4713_v25, 0.0 }
 0x246   : > { %v1675_v55 = vadd.f32 1e-06, %v1667_v45  ;;  %v1621_v60 = vmul.f32 %v4723_v3, %v4492_v20  ;;  %v1661_v37 = vmul.f32 %v4723_v3, %v4723_v3  ;;  %vm1699_vm11 = vcmp.ge.f32.partialorder %v4715_v59, 0.0 }
 0x247   : > { %3868 = vrcp.f32 %v1676_v14  ;;  %v4729_v28 = vadd.f32 %v1622_v52, %v1614_v54  ;;  %v1670_v58 = vadd.f32 %v1662_v48, %v1654_v4 }
 0x248   : > { %3870 = vrcp.f32 %v1675_v55  ;;  %v4731_v42 = vadd.f32 %v1621_v60, %v1613_v19  ;;  %v1669_v39 = vadd.f32 %v1661_v37, %v1653_v63  ;;  %v4733_v46 = vpop.f32.mrb[20].mxu1  ;;  %v1742_v37 = vunpack.c.0.s8 %v1741_v50 }
 0x249   : > { %v1678_v45 = vadd.f32 1e-06, %v1670_v58  ;;  %v1624_v36 = vmul.f32 %v4733_v46, %v4510_v30  ;;  %v1664_v22 = vmul.f32 %v4733_v46, %v4733_v46  ;;  %v4739_v14 = vpop.f32.mrb[21].mxu1  ;;  %v1744_v58 = vshrl.u32 %v1743_v53, 7 }
 0x24a   : > { %v1677_v54 = vadd.f32 1e-06, %v1669_v39  ;;  %v1623_v4 = vmul.f32 %v4739_v14, %v4517_v35  ;;  %v1663_v19 = vmul.f32 %v4739_v14, %v4739_v14  ;;  %vm1702_vm12 = vcmp.ge.f32.partialorder %v4729_v28, 0.0 }
 0x24b   : > { %3872 = vrcp.f32 %v1678_v45  ;;  %v4745_v63 = vadd.f32 %v1624_v36, %v1616_v24  ;;  %v1672_v55 = vadd.f32 %v1664_v22, %v1656_v62  ;;  %vm1701_vm13 = vcmp.ge.f32.partialorder %v4731_v42, 0.0 }
 0x24c   : > { %3874 = vrcp.f32 %v1677_v54  ;;  %v4747_v52 = vadd.f32 %v1623_v4, %v1615_v26  ;;  %v1671_v48 = vadd.f32 %v1663_v19, %v1655_v29  ;;  %v4749_v60 = vpop.f32.mrb[22].mxu1  ;;  %v4765_v54 = vsub.s32 %v1742_v37, %v1744_v58 }
 0x24d   : > { %v1626_v31 = vmul.f32 %v4749_v60, %v4536_v57  ;;  %v1666_v39 = vmul.f32 %v4749_v60, %v4749_v60  ;;  %v4755_v35 = vpop.f32.mrb[23].mxu1  ;;  %v1680_v45 = vadd.f32 1e-06, %v1672_v55  ;;  %vm1704_vm14 = vcmp.ge.f32.partialorder %v4745_v63, 0.0 }
 0x24e   : > { %v1625_v36 = vmul.f32 %v4755_v35, %v4547_v61  ;;  %v1665_v22 = vmul.f32 %v4755_v35, %v4755_v35  ;;  %v1679_v24 = vadd.f32 1e-06, %v1671_v48  ;;  %vm1703_vm15 = vcmp.ge.f32.partialorder %v4747_v52, 0.0 }
 0x24f   : > { %v4761_v62 = vadd.f32 %v1626_v31, %v1618_v0  ;;  %v1674_v26 = vadd.f32 %v1666_v39, %v1658_v10  ;;  %3876 = vrcp.f32 %v1680_v45 }
 0x250   : > { %v4763_v53 = vadd.f32 %v1625_v36, %v1617_v33  ;;  %v1673_v29 = vadd.f32 %v1665_v22, %v1657_v2  ;;  %3878 = vrcp.f32 %v1679_v24 }
 0x251   : > { %v3869_v50 = vpop.eup %3868  ;;  %v1682_v4 = vadd.f32 1e-06, %v1674_v26  ;;  %vm1706_vm0 = vcmp.ge.f32.partialorder %v4761_v62, 0.0 }
 0x252   : > { %v3871_v19 = vpop.eup %3870  ;;  %v1686_v55 = vmul.f32 %v3869_v50, %v4713_v25  ;;  %v1681_v61 = vadd.f32 1e-06, %v1673_v29  ;;  %vm1705_vm1 = vcmp.ge.f32.partialorder %v4763_v53, 0.0 }
 0x253   : > { %v1684_v48 = vmul.f32 %v3871_v19, %v4715_v59  ;;  %3880 = vrcp.f32 %v1682_v4 }
 0x254   : > { %v1708_v0 = vmul.f32 %v4605_v32, %v1686_v55  ;;  %v2261_v10 = vmul.f32 %v4607_v18, %v1686_v55  ;;  %v2813_v33 = vmul.f32 %v4701_v27, %v1686_v55  ;;  %3882 = vrcp.f32 %v1681_v61 }
 0x255   : > { %v3873_v2 = vpop.eup %3872  ;;  %v1707_v37 = vmul.f32 %v1684_v48, %v4617_v43  ;;  %v2260_v58 = vmul.f32 %v1684_v48, %v4619_v21  ;;  %v4777_v31 = vmul.f32 %v1684_v48, %v4707_v6 }
 0x256   : > { %v3875_v39 = vpop.eup %3874  ;;  %v1716_v45 = vsub.f32 %v4472_v11, %v1708_v0  ;;  %v2269_v36 = vsub.f32 %v4485_v15, %v2261_v10  ;;  %v2821_v32 = vsub.f32 %v4459_v44, %v2813_v33  ;;  %v4783_v18 = vmul.f32 %v3873_v2, %v4729_v28 }
 0x257   : > { %v1715_v27 = vsub.f32 %v4467_v56, %v1707_v37  ;;  %v2268_v43 = vsub.f32 %v4483_v17, %v2260_v58  ;;  %v2820_v21 = vsub.f32 %v4465_v12, %v4777_v31  ;;  %v4791_v61 = vmul.f32 %v3875_v39, %v4731_v42 }
 0x258   : > { %v1724_v6 = vsel %vm1700_vm10, %v4472_v11, %v1716_v45  ;;  %v2277_v22 = vsel %vm1700_vm10, %v4485_v15, %v2269_v36  ;;  %v2829_v24 = vsel %vm1700_vm10, %v4459_v44, %v2821_v32  ;;  %v4804_v26 = vmul.f32 %v4629_v9, %v4783_v18 }
 0x259   : > { %v1788_v29 = vcombine.high %v1724_v6, %v1724_v6  ;;  %v1795_v50 = vrot.slane %v1724_v6, %v4765_v54  ;;  %v2341_v4 = vcombine.high %v2277_v22, %v2277_v22  ;;  %v2348_v19 = vrot.slane %v2277_v22, %v4765_v54  ;;  %v4827_v10 = vpop.eup %3876 }
 0x25a   : > { %v2893_v11 = vcombine.high %v2829_v24, %v2829_v24  ;;  %v2900_v15 = vrot.slane %v2829_v24, %v4765_v54  ;;  %v4817_v44 = vsel %vm1699_vm11, %v4467_v56, %v1715_v27  ;;  %v4822_v9 = vsel %vm1699_vm11, %v4483_v17, %v2268_v43  ;;  %v4831_v58 = vpop.eup %3878 }
 0x25b   : > { %v1802_v25 = vrot.slane %v1788_v29, %v4765_v54  ;;  %v1803_v55 = vcombine.high %v1795_v50, %v1795_v50  ;;  %v1811_v48 = vrot.slane %v1795_v50, %v4765_v54  ;;  %v2355_v0 = vrot.slane %v2341_v4, %v4765_v54 }
 0x25c   : > { %v2356_v33 = vcombine.high %v2348_v19, %v2348_v19  ;;  %v2364_v56 = vrot.slane %v2348_v19, %v4765_v54  ;;  %v2907_v2 = vrot.slane %v2893_v11, %v4765_v54  ;;  %v2908_v37 = vcombine.high %v2900_v15, %v2900_v15 }
 0x25d   : > { %v1804_v17 = vcombine.high %v1802_v25, %v1802_v25  ;;  %v1818_v39 = vrot.slane %v1802_v25, %v4765_v54  ;;  %v1825_v45 = vrot.slane %v1803_v55, %v4765_v54  ;;  %v1833_v36 = vcombine.high %v1811_v48, %v1811_v48  ;;  %2204 = vst.msk [vmem:[%s4811_s30 + $0x20] sm:$0x1] %vm2195_vm8, %v1811_v48  ;;  %v4837_v32 = vpop.eup %3880 }
 0x25e   : > { %v2357_v27 = vcombine.high %v2355_v0, %v2355_v0  ;;  %v2371_v43 = vrot.slane %v2355_v0, %v4765_v54  ;;  %v2378_v6 = vrot.slane %v2356_v33, %v4765_v54  ;;  %v2386_v22 = vcombine.high %v2364_v56, %v2364_v56  ;;  %2756 = vst.msk [vmem:[%s4811_s30 + $0x21] sm:$0x1] %vm2195_vm8, %v2364_v56  ;;  %v4843_v24 = vpop.eup %3882 }
 0x25f   : > { %v1832_v29 = vrot.slane %v1804_v17, %v4765_v54  ;;  %v1834_v50 = vcombine.high %v1818_v39, %v1818_v39  ;;  %v1835_v4 = vcombine.high %v1825_v45, %v1825_v45  ;;  %2205 = vst.msk [vmem:[%s4811_s30 + $0x24] sm:$0x1] %vm2195_vm8, %v1825_v45  ;;  %2206 = vst.msk [vmem:[%s4811_s30 + $0x28] sm:$0x1] %vm2195_vm8, %v1833_v36 }
 0x260   : > { %2208 = vst.msk [vmem:[%s4811_s30 + $0x30] sm:$0x1] %vm2195_vm8, %v1818_v39  ;;  %v2909_v19 = vcombine.high %v2907_v2, %v2907_v2  ;;  %v2385_v11 = vrot.slane %v2357_v27, %v4765_v54  ;;  %v2387_v25 = vcombine.high %v2371_v43, %v2371_v43  ;;  %v2388_v55 = vcombine.high %v2378_v6, %v2378_v6 }
 0x261   : > { %2757 = vst.msk [vmem:[%s4811_s30 + $0x25] sm:$0x1] %vm2195_vm8, %v2378_v6  ;;  %2758 = vst.msk [vmem:[%s4811_s30 + $0x29] sm:$0x1] %vm2195_vm8, %v2386_v22  ;;  %v2916_v48 = vrot.slane %v2900_v15, %v4765_v54  ;;  %v1836_v0 = vcombine.high %v1832_v29, %v1832_v29  ;;  %v2923_v33 = vrot.slane %v2907_v2, %v4765_v54 }
 0x262   : > { %2760 = vst.msk [vmem:[%s4811_s30 + $0x31] sm:$0x1] %vm2195_vm8, %v2371_v43  ;;  %2207 = vst.msk [vmem:[%s4811_s30 + $0x2c] sm:$0x1] %vm2195_vm8, %v1835_v4  ;;  %v2930_v56 = vrot.slane %v2908_v37, %v4765_v54  ;;  %v2937_v17 = vrot.slane %v2909_v19, %v4765_v54  ;;  %v2389_v15 = vcombine.high %v2385_v11, %v2385_v11 }
 0x263   : > { %2209 = vst.msk [vmem:[%s4811_s30 + $0x34] sm:$0x1] %vm2195_vm8, %v1832_v29  ;;  %2210 = vst.msk [vmem:[%s4811_s30 + $0x38] sm:$0x1] %vm2195_vm8, %v1834_v50  ;;  %v2938_v39 = vcombine.high %v2916_v48, %v2916_v48  ;;  %v1739_v2 = vcombine.high %v4817_v44, %v4817_v44  ;;  %v1746_v37 = vrot.slane %v4817_v44, %v4765_v54 }
 0x264   : > { %2759 = vst.msk [vmem:[%s4811_s30 + $0x2d] sm:$0x1] %vm2195_vm8, %v2388_v55  ;;  %2761 = vst.msk [vmem:[%s4811_s30 + $0x35] sm:$0x1] %vm2195_vm8, %v2385_v11  ;;  %v2939_v45 = vcombine.high %v2923_v33, %v2923_v33  ;;  %v2940_v36 = vcombine.high %v2930_v56, %v2930_v56  ;;  %v2941_v27 = vcombine.high %v2937_v17, %v2937_v17 }
 0x265   : > { %2762 = vst.msk [vmem:[%s4811_s30 + $0x39] sm:$0x1] %vm2195_vm8, %v2387_v25  ;;  %3308 = vst.msk [vmem:[%s4811_s30 + $0x22] sm:$0x1] %vm2195_vm8, %v2916_v48  ;;  %v2292_v43 = vcombine.high %v4822_v9, %v4822_v9  ;;  %v1753_v44 = vrot.slane %v1739_v2, %v4765_v54  ;;  %v1754_v6 = vcombine.high %v1746_v37, %v1746_v37 }
 0x266   : > { %2211 = vst.msk [vmem:[%s4811_s30 + $0x3c] sm:$0x1] %vm2195_vm8, %v1836_v0  ;;  %3309 = vst.msk [vmem:[%s4811_s30 + $0x26] sm:$0x1] %vm2195_vm8, %v2930_v56  ;;  %v1762_v22 = vrot.slane %v1746_v37, %v4765_v54  ;;  %v2299_v29 = vrot.slane %v4822_v9, %v4765_v54  ;;  %v2828_v4 = vsel %vm1699_vm11, %v4465_v12, %v2820_v21 }
 0x267   : > { %3312 = vst.msk [vmem:[%s4811_s30 + $0x32] sm:$0x1] %vm2195_vm8, %v2923_v33  ;;  %3313 = vst.msk [vmem:[%s4811_s30 + $0x36] sm:$0x1] %vm2195_vm8, %v2937_v17  ;;  %v2306_v50 = vrot.slane %v2292_v43, %v4765_v54  ;;  %v1718_v9 = vsub.f32 %v4500_v23, %v4804_v26  ;;  %v4917_v19 = vmul.f32 %v4631_v49, %v4783_v18 }
 0x268   : > { %2763 = vst.msk [vmem:[%s4811_s30 + $0x3d] sm:$0x1] %vm2195_vm8, %v2389_v15  ;;  %3310 = vst.msk [vmem:[%s4811_s30 + $0x2a] sm:$0x1] %vm2195_vm8, %v2938_v39  ;;  %v1755_v11 = vcombine.high %v1753_v44, %v1753_v44  ;;  %v1769_v25 = vrot.slane %v1753_v44, %v4765_v54  ;;  %v1776_v55 = vrot.slane %v1754_v6, %v4765_v54 }
 0x269   : > { %3311 = vst.msk [vmem:[%s4811_s30 + $0x2e] sm:$0x1] %vm2195_vm8, %v2940_v36  ;;  %3314 = vst.msk [vmem:[%s4811_s30 + $0x3a] sm:$0x1] %vm2195_vm8, %v2939_v45  ;;  %v1784_v31 = vcombine.high %v1762_v22, %v1762_v22  ;;  %v2307_v59 = vcombine.high %v2299_v29, %v2299_v29  ;;  %v2308_v12 = vcombine.high %v2306_v50, %v2306_v50 }
 0x26a   : > { %3315 = vst.msk [vmem:[%s4811_s30 + $0x3e] sm:$0x1] %vm2195_vm8, %v2941_v27  ;;  %2196 = vst.msk [vmem:[%s4811_s30] sm:$0x1] %vm2195_vm8, %v1762_v22  ;;  %v2315_v21 = vrot.slane %v2299_v29, %v4765_v54  ;;  %v2322_v26 = vrot.slane %v2306_v50, %v4765_v54  ;;  %v1783_v49 = vrot.slane %v1755_v11, %v4765_v54 }
 0x26b   : > { %v1785_v48 = vcombine.high %v1769_v25, %v1769_v25  ;;  %v1786_v0 = vcombine.high %v1776_v55, %v1776_v55  ;;  %2197 = vst.msk [vmem:[%s4811_s30 + $0x4] sm:$0x1] %vm2195_vm8, %v1776_v55  ;;  %2198 = vst.msk [vmem:[%s4811_s30 + $0x8] sm:$0x1] %vm2195_vm8, %v1784_v31  ;;  %v2844_v33 = vcombine.high %v2828_v4, %v2828_v4 }
 0x26c   : > { %2200 = vst.msk [vmem:[%s4811_s30 + $0x10] sm:$0x1] %vm2195_vm8, %v1769_v25  ;;  %v2329_v56 = vrot.slane %v2307_v59, %v4765_v54  ;;  %v2336_v17 = vrot.slane %v2308_v12, %v4765_v54  ;;  %v2337_v15 = vcombine.high %v2315_v21, %v2315_v21  ;;  %v2338_v39 = vcombine.high %v2322_v26, %v2322_v26 }
 0x26d   : > { %2748 = vst.msk [vmem:[%s4811_s30 + $0x1] sm:$0x1] %vm2195_vm8, %v2315_v21  ;;  %2752 = vst.msk [vmem:[%s4811_s30 + $0x11] sm:$0x1] %vm2195_vm8, %v2322_v26  ;;  %v1787_v2 = vcombine.high %v1783_v49, %v1783_v49  ;;  %v2851_v37 = vrot.slane %v2828_v4, %v4765_v54  ;;  %v2858_v45 = vrot.slane %v2844_v33, %v4765_v54 }
 0x26e   : > { %2199 = vst.msk [vmem:[%s4811_s30 + $0xc] sm:$0x1] %vm2195_vm8, %v1786_v0  ;;  %2201 = vst.msk [vmem:[%s4811_s30 + $0x14] sm:$0x1] %vm2195_vm8, %v1783_v49  ;;  %v1726_v36 = vsel %vm1702_vm12, %v4500_v23, %v1718_v9  ;;  %v2339_v27 = vcombine.high %v2329_v56, %v2329_v56  ;;  %v2340_v43 = vcombine.high %v2336_v17, %v2336_v17 }
 0x26f   : > { %2202 = vst.msk [vmem:[%s4811_s30 + $0x18] sm:$0x1] %vm2195_vm8, %v1785_v48  ;;  %2749 = vst.msk [vmem:[%s4811_s30 + $0x5] sm:$0x1] %vm2195_vm8, %v2329_v56  ;;  %v1886_v44 = vcombine.high %v1726_v36, %v1726_v36  ;;  %v1893_v6 = vrot.slane %v1726_v36, %v4765_v54  ;;  %v2859_v22 = vcombine.high %v2851_v37, %v2851_v37 }
 0x270   : > { %2750 = vst.msk [vmem:[%s4811_s30 + $0x9] sm:$0x1] %vm2195_vm8, %v2337_v15  ;;  %2753 = vst.msk [vmem:[%s4811_s30 + $0x15] sm:$0x1] %vm2195_vm8, %v2336_v17  ;;  %v2860_v29 = vcombine.high %v2858_v45, %v2858_v45  ;;  %v2867_v23 = vrot.slane %v2851_v37, %v4765_v54  ;;  %v2874_v50 = vrot.slane %v2858_v45, %v4765_v54 }
 0x271   : > { %2754 = vst.msk [vmem:[%s4811_s30 + $0x19] sm:$0x1] %vm2195_vm8, %v2338_v39  ;;  %2203 = vst.msk [vmem:[%s4811_s30 + $0x1c] sm:$0x1] %vm2195_vm8, %v1787_v2  ;;  %v1900_v4 = vrot.slane %v1886_v44, %v4765_v54  ;;  %v1901_v9 = vcombine.high %v1893_v6, %v1893_v6  ;;  %v1909_v11 = vrot.slane %v1893_v6, %v4765_v54 }
 0x272   : > { %2751 = vst.msk [vmem:[%s4811_s30 + $0xd] sm:$0x1] %vm2195_vm8, %v2339_v27  ;;  %2755 = vst.msk [vmem:[%s4811_s30 + $0x1d] sm:$0x1] %vm2195_vm8, %v2340_v43  ;;  %v2271_v25 = vsub.f32 %v4506_v47, %v4917_v19  ;;  %v2881_v55 = vrot.slane %v2859_v22, %v4765_v54  ;;  %v2888_v31 = vrot.slane %v2860_v29, %v4765_v54 }
 0x273   : > { %v2889_v59 = vcombine.high %v2867_v23, %v2867_v23  ;;  %v2890_v12 = vcombine.high %v2874_v50, %v2874_v50  ;;  %3300 = vst.msk [vmem:[%s4811_s30 + $0x2] sm:$0x1] %vm2195_vm8, %v2867_v23  ;;  %3304 = vst.msk [vmem:[%s4811_s30 + $0x12] sm:$0x1] %vm2195_vm8, %v2874_v50  ;;  %v1902_v21 = vcombine.high %v1900_v4, %v1900_v4 }
 0x274   : > { %v1916_v26 = vrot.slane %v1900_v4, %v4765_v54  ;;  %v1923_v19 = vrot.slane %v1901_v9, %v4765_v54  ;;  %v1931_v49 = vcombine.high %v1909_v11, %v1909_v11  ;;  %2220 = vst.msk [vmem:[%s4811_s30 + $0x60] sm:$0x1] %vm2195_vm8, %v1909_v11  ;;  %v2891_v48 = vcombine.high %v2881_v55, %v2881_v55 }
 0x275   : > { %v2892_v0 = vcombine.high %v2888_v31, %v2888_v31  ;;  %3301 = vst.msk [vmem:[%s4811_s30 + $0x6] sm:$0x1] %vm2195_vm8, %v2881_v55  ;;  %3302 = vst.msk [vmem:[%s4811_s30 + $0xa] sm:$0x1] %vm2195_vm8, %v2889_v59  ;;  %v2279_v33 = vsel %vm1702_vm12, %v4506_v47, %v2271_v25  ;;  %v2815_v56 = vmul.f32 %v4717_v13, %v4783_v18 }
 0x276   : > { %3305 = vst.msk [vmem:[%s4811_s30 + $0x16] sm:$0x1] %vm2195_vm8, %v2888_v31  ;;  %3306 = vst.msk [vmem:[%s4811_s30 + $0x1a] sm:$0x1] %vm2195_vm8, %v2890_v12  ;;  %v1930_v17 = vrot.slane %v1902_v21, %v4765_v54  ;;  %v1932_v15 = vcombine.high %v1916_v26, %v1916_v26  ;;  %v1933_v39 = vcombine.high %v1923_v19, %v1923_v19 }
 0x277   : > { %2221 = vst.msk [vmem:[%s4811_s30 + $0x64] sm:$0x1] %vm2195_vm8, %v1923_v19  ;;  %2222 = vst.msk [vmem:[%s4811_s30 + $0x68] sm:$0x1] %vm2195_vm8, %v1931_v49  ;;  %v2439_v2 = vcombine.high %v2279_v33, %v2279_v33  ;;  %v2446_v47 = vrot.slane %v2279_v33, %v4765_v54  ;;  %v2823_v13 = vsub.f32 %v4488_v5, %v2815_v56 }
 0x278   : > { %2224 = vst.msk [vmem:[%s4811_s30 + $0x70] sm:$0x1] %vm2195_vm8, %v1916_v26  ;;  %3303 = vst.msk [vmem:[%s4811_s30 + $0xe] sm:$0x1] %vm2195_vm8, %v2891_v48  ;;  %v1709_v18 = vmul.f32 %v4791_v61, %v4641_v1  ;;  %v2262_v37 = vmul.f32 %v4791_v61, %v4643_v16  ;;  %v1934_v45 = vcombine.high %v1930_v17, %v1930_v17 }
 0x279   : > { %3307 = vst.msk [vmem:[%s4811_s30 + $0x1e] sm:$0x1] %vm2195_vm8, %v2892_v0  ;;  %2223 = vst.msk [vmem:[%s4811_s30 + $0x6c] sm:$0x1] %vm2195_vm8, %v1933_v39  ;;  %v2453_v36 = vrot.slane %v2439_v2, %v4765_v54  ;;  %v5020_v27 = vmul.f32 %v4791_v61, %v4723_v3  ;;  %v5024_v1 = vmul.f32 %v4827_v10, %v4745_v63 }
 0x27a   : > { %2225 = vst.msk [vmem:[%s4811_s30 + $0x74] sm:$0x1] %vm2195_vm8, %v1930_v17  ;;  %2226 = vst.msk [vmem:[%s4811_s30 + $0x78] sm:$0x1] %vm2195_vm8, %v1932_v15  ;;  %v2454_v43 = vcombine.high %v2446_v47, %v2446_v47  ;;  %v2462_v16 = vrot.slane %v2446_v47, %v4765_v54  ;;  %v2831_v44 = vsel %vm1702_vm12, %v4488_v5, %v2823_v13 }
 0x27b   : > { %v1717_v6 = vsub.f32 %v4496_v7, %v1709_v18  ;;  %2227 = vst.msk [vmem:[%s4811_s30 + $0x7c] sm:$0x1] %vm2195_vm8, %v1934_v45  ;;  %v2455_v22 = vcombine.high %v2453_v36, %v2453_v36  ;;  %v2469_v3 = vrot.slane %v2453_v36, %v4765_v54  ;;  %v2991_v61 = vcombine.high %v2831_v44, %v2831_v44 }
 0x27c   : > { %v2998_v10 = vrot.slane %v2831_v44, %v4765_v54  ;;  %v2476_v29 = vrot.slane %v2454_v43, %v4765_v54  ;;  %v2484_v23 = vcombine.high %v2462_v16, %v2462_v16  ;;  %2772 = vst.msk [vmem:[%s4811_s30 + $0x61] sm:$0x1] %vm2195_vm8, %v2462_v16  ;;  %v2270_v28 = vsub.f32 %v4502_v34, %v2262_v37 }
 0x27d   : > { %v1725_v5 = vsel %vm1701_vm13, %v4496_v7, %v1717_v6  ;;  %v2483_v50 = vrot.slane %v2455_v22, %v4765_v54  ;;  %v2485_v4 = vcombine.high %v2469_v3, %v2469_v3  ;;  %2776 = vst.msk [vmem:[%s4811_s30 + $0x71] sm:$0x1] %vm2195_vm8, %v2469_v3  ;;  %v3005_v9 = vrot.slane %v2991_v61, %v4765_v54 }
 0x27e   : > { %v3006_v11 = vcombine.high %v2998_v10, %v2998_v10  ;;  %v2486_v25 = vcombine.high %v2476_v29, %v2476_v29  ;;  %2773 = vst.msk [vmem:[%s4811_s30 + $0x65] sm:$0x1] %vm2195_vm8, %v2476_v29  ;;  %2774 = vst.msk [vmem:[%s4811_s30 + $0x69] sm:$0x1] %vm2195_vm8, %v2484_v23  ;;  %v3014_v55 = vrot.slane %v2998_v10, %v4765_v54 }
 0x27f   : > { %v1837_v7 = vcombine.high %v1725_v5, %v1725_v5  ;;  %v1844_v31 = vrot.slane %v1725_v5, %v4765_v54  ;;  %v2487_v59 = vcombine.high %v2483_v50, %v2483_v50  ;;  %2777 = vst.msk [vmem:[%s4811_s30 + $0x75] sm:$0x1] %vm2195_vm8, %v2483_v50  ;;  %2778 = vst.msk [vmem:[%s4811_s30 + $0x79] sm:$0x1] %vm2195_vm8, %v2485_v4 }
 0x280   : > { %v3007_v12 = vcombine.high %v3005_v9, %v3005_v9  ;;  %v3021_v21 = vrot.slane %v3005_v9, %v4765_v54  ;;  %v3028_v26 = vrot.slane %v3006_v11, %v4765_v54  ;;  %2775 = vst.msk [vmem:[%s4811_s30 + $0x6d] sm:$0x1] %vm2195_vm8, %v2486_v25  ;;  %v3036_v19 = vcombine.high %v3014_v55, %v3014_v55 }
 0x281   : > { %3324 = vst.msk [vmem:[%s4811_s30 + $0x62] sm:$0x1] %vm2195_vm8, %v3014_v55  ;;  %v1851_v49 = vrot.slane %v1837_v7, %v4765_v54  ;;  %v1852_v48 = vcombine.high %v1844_v31, %v1844_v31  ;;  %v1860_v0 = vrot.slane %v1844_v31, %v4765_v54  ;;  %2779 = vst.msk [vmem:[%s4811_s30 + $0x7d] sm:$0x1] %vm2195_vm8, %v2487_v59 }
 0x282   : > { %v3035_v33 = vrot.slane %v3007_v12, %v4765_v54  ;;  %v3037_v56 = vcombine.high %v3021_v21, %v3021_v21  ;;  %v3038_v17 = vcombine.high %v3028_v26, %v3028_v26  ;;  %3325 = vst.msk [vmem:[%s4811_s30 + $0x66] sm:$0x1] %vm2195_vm8, %v3028_v26  ;;  %3328 = vst.msk [vmem:[%s4811_s30 + $0x72] sm:$0x1] %vm2195_vm8, %v3021_v21 }
 0x283   : > { %v2278_v15 = vsel %vm1701_vm13, %v4502_v34, %v2270_v28  ;;  %3326 = vst.msk [vmem:[%s4811_s30 + $0x6a] sm:$0x1] %vm2195_vm8, %v3036_v19  ;;  %v1853_v39 = vcombine.high %v1851_v49, %v1851_v49  ;;  %v1867_v2 = vrot.slane %v1851_v49, %v4765_v54  ;;  %v1874_v47 = vrot.slane %v1852_v48, %v4765_v54 }
 0x284   : > { %v1882_v13 = vcombine.high %v1860_v0, %v1860_v0  ;;  %2212 = vst.msk [vmem:[%s4811_s30 + $0x40] sm:$0x1] %vm2195_vm8, %v1860_v0  ;;  %v3039_v18 = vcombine.high %v3035_v33, %v3035_v33  ;;  %3327 = vst.msk [vmem:[%s4811_s30 + $0x6e] sm:$0x1] %vm2195_vm8, %v3038_v17  ;;  %v2390_v34 = vcombine.high %v2278_v15, %v2278_v15 }
 0x285   : > { %3329 = vst.msk [vmem:[%s4811_s30 + $0x76] sm:$0x1] %vm2195_vm8, %v3035_v33  ;;  %3330 = vst.msk [vmem:[%s4811_s30 + $0x7a] sm:$0x1] %vm2195_vm8, %v3037_v56  ;;  %v2397_v37 = vrot.slane %v2278_v15, %v4765_v54  ;;  %v2822_v45 = vsub.f32 %v4492_v20, %v5020_v27  ;;  %v1881_v36 = vrot.slane %v1853_v39, %v4765_v54 }
 0x286   : > { %v1883_v43 = vcombine.high %v1867_v2, %v1867_v2  ;;  %v1884_v16 = vcombine.high %v1874_v47, %v1874_v47  ;;  %2213 = vst.msk [vmem:[%s4811_s30 + $0x44] sm:$0x1] %vm2195_vm8, %v1874_v47  ;;  %2214 = vst.msk [vmem:[%s4811_s30 + $0x48] sm:$0x1] %vm2195_vm8, %v1882_v13  ;;  %v1712_v44 = vmul.f32 %v4653_v40, %v5024_v1 }
 0x287   : > { %2216 = vst.msk [vmem:[%s4811_s30 + $0x50] sm:$0x1] %vm2195_vm8, %v1867_v2  ;;  %3331 = vst.msk [vmem:[%s4811_s30 + $0x7e] sm:$0x1] %vm2195_vm8, %v3039_v18  ;;  %v2404_v6 = vrot.slane %v2390_v34, %v4765_v54  ;;  %v2405_v27 = vcombine.high %v2397_v37, %v2397_v37  ;;  %v2413_v22 = vrot.slane %v2397_v37, %v4765_v54 }
 0x288   : > { %v2830_v3 = vsel %vm1701_vm13, %v4492_v20, %v2822_v45  ;;  %v1885_v61 = vcombine.high %v1881_v36, %v1881_v36  ;;  %2215 = vst.msk [vmem:[%s4811_s30 + $0x4c] sm:$0x1] %vm2195_vm8, %v1884_v16  ;;  %2217 = vst.msk [vmem:[%s4811_s30 + $0x54] sm:$0x1] %vm2195_vm8, %v1881_v36  ;;  %v1720_v29 = vsub.f32 %v4514_v38, %v1712_v44 }
 0x289   : > { %2218 = vst.msk [vmem:[%s4811_s30 + $0x58] sm:$0x1] %vm2195_vm8, %v1883_v43  ;;  %v2942_v40 = vcombine.high %v2830_v3, %v2830_v3  ;;  %v2949_v10 = vrot.slane %v2830_v3, %v4765_v54  ;;  %v2406_v23 = vcombine.high %v2404_v6, %v2404_v6  ;;  %v2420_v5 = vrot.slane %v2404_v6, %v4765_v54  ;;  %v5536_v43 = vld [vmem:[#allocation10_spill] sm:$0xff]  ;;  %v5538_v3 = vld [vmem:[#allocation4_spill] sm:$0xff] }
 0x28a   : > { %v2427_v20 = vrot.slane %v2405_v27, %v4765_v54  ;;  %v2435_v42 = vcombine.high %v2413_v22, %v2413_v22  ;;  %2764 = vst.msk [vmem:[%s4811_s30 + $0x41] sm:$0x1] %vm2195_vm8, %v2413_v22  ;;  %2219 = vst.msk [vmem:[%s4811_s30 + $0x5c] sm:$0x1] %vm2195_vm8, %v1885_v61  ;;  %v1728_v9 = vsel %vm1704_vm14, %v4514_v38, %v1720_v29  ;;  %v5537_v22 = vld [vmem:[#allocation3_spill] sm:$0xff] }
 0x28b   : > { %v2956_v28 = vrot.slane %v2942_v40, %v4765_v54  ;;  %v2957_v50 = vcombine.high %v2949_v10, %v2949_v10  ;;  %v2965_v4 = vrot.slane %v2949_v10, %v4765_v54  ;;  %v2434_v11 = vrot.slane %v2406_v23, %v4765_v54  ;;  %2768 = vst.msk [vmem:[%s4811_s30 + $0x51] sm:$0x1] %vm2195_vm8, %v2420_v5 }
 0x28c   : > { %v2436_v25 = vcombine.high %v2420_v5, %v2420_v5  ;;  %v2437_v55 = vcombine.high %v2427_v20, %v2427_v20  ;;  %2765 = vst.msk [vmem:[%s4811_s30 + $0x45] sm:$0x1] %vm2195_vm8, %v2427_v20  ;;  %2766 = vst.msk [vmem:[%s4811_s30 + $0x49] sm:$0x1] %vm2195_vm8, %v2435_v42  ;;  %v1984_v7 = vcombine.high %v1728_v9, %v1728_v9 }
 0x28d   : > { %v2958_v31 = vcombine.high %v2956_v28, %v2956_v28  ;;  %v2972_v59 = vrot.slane %v2956_v28, %v4765_v54  ;;  %v2979_v12 = vrot.slane %v2957_v50, %v4765_v54  ;;  %v2987_v38 = vcombine.high %v2965_v4, %v2965_v4  ;;  %3316 = vst.msk [vmem:[%s4811_s30 + $0x42] sm:$0x1] %vm2195_vm8, %v2965_v4 }
 0x28e   : > { %v2438_v21 = vcombine.high %v2434_v11, %v2434_v11  ;;  %2767 = vst.msk [vmem:[%s4811_s30 + $0x4d] sm:$0x1] %vm2195_vm8, %v2437_v55  ;;  %2769 = vst.msk [vmem:[%s4811_s30 + $0x55] sm:$0x1] %vm2195_vm8, %v2434_v11  ;;  %v1991_v26 = vrot.slane %v1728_v9, %v4765_v54  ;;  %v1998_v19 = vrot.slane %v1984_v7, %v4765_v54 }
 0x28f   : > { %2770 = vst.msk [vmem:[%s4811_s30 + $0x59] sm:$0x1] %vm2195_vm8, %v2436_v25  ;;  %v2265_v49 = vmul.f32 %v4655_v8, %v5024_v1  ;;  %v2986_v48 = vrot.slane %v2958_v31, %v4765_v54  ;;  %v2988_v0 = vcombine.high %v2972_v59, %v2972_v59  ;;  %v2989_v33 = vcombine.high %v2979_v12, %v2979_v12 }
 0x290   : > { %3317 = vst.msk [vmem:[%s4811_s30 + $0x46] sm:$0x1] %vm2195_vm8, %v2979_v12  ;;  %3318 = vst.msk [vmem:[%s4811_s30 + $0x4a] sm:$0x1] %vm2195_vm8, %v2987_v38  ;;  %v2817_v56 = vmul.f32 %v4733_v46, %v5024_v1  ;;  %v1999_v8 = vcombine.high %v1991_v26, %v1991_v26  ;;  %v2000_v17 = vcombine.high %v1998_v19, %v1998_v19 }
 0x291   : > { %3320 = vst.msk [vmem:[%s4811_s30 + $0x52] sm:$0x1] %vm2195_vm8, %v2972_v59  ;;  %2771 = vst.msk [vmem:[%s4811_s30 + $0x5d] sm:$0x1] %vm2195_vm8, %v2438_v21  ;;  %v2007_v15 = vrot.slane %v1991_v26, %v4765_v54  ;;  %v2014_v39 = vrot.slane %v1998_v19, %v4765_v54  ;;  %v2990_v2 = vcombine.high %v2986_v48, %v2986_v48 }
 0x292   : > { %3319 = vst.msk [vmem:[%s4811_s30 + $0x4e] sm:$0x1] %vm2195_vm8, %v2989_v33  ;;  %3321 = vst.msk [vmem:[%s4811_s30 + $0x56] sm:$0x1] %vm2195_vm8, %v2986_v48  ;;  %v2273_v46 = vsub.f32 %v4528_v51, %v2265_v49  ;;  %v2825_v1 = vsub.f32 %v4510_v30, %v2817_v56  ;;  %v1692_v47 = vmul.f32 %v4831_v58, %v4747_v52  ;;  %v5539_v56 = vld [vmem:[#allocation2_spill] sm:$0xff] }
 0x293   : > { %3322 = vst.msk [vmem:[%s4811_s30 + $0x5a] sm:$0x1] %vm2195_vm8, %v2988_v0  ;;  %v2021_v13 = vrot.slane %v1999_v8, %v4765_v54  ;;  %v2028_v18 = vrot.slane %v2000_v17, %v4765_v54  ;;  %v2029_v34 = vcombine.high %v2007_v15, %v2007_v15  ;;  %v2030_v37 = vcombine.high %v2014_v39, %v2014_v39 }
 0x294   : > { %2236 = vst.msk [vmem:[%s4811_s30 + $0xa0] sm:$0x1] %vm2195_vm8, %v2007_v15  ;;  %2240 = vst.msk [vmem:[%s4811_s30 + $0xb0] sm:$0x1] %vm2195_vm8, %v2014_v39  ;;  %v2281_v45 = vsel %vm1704_vm14, %v4528_v51, %v2273_v46  ;;  %v2833_v58 = vsel %vm1704_vm14, %v4510_v30, %v2825_v1  ;;  %v1711_v36 = vmul.f32 %v1692_v47, %v4665_v41 }
 0x295   : > { %3323 = vst.msk [vmem:[%s4811_s30 + $0x5e] sm:$0x1] %vm2195_vm8, %v2990_v2  ;;  %v2264_v16 = vmul.f32 %v1692_v47, %v5536_v43  ;;  %v2031_v44 = vcombine.high %v2021_v13, %v2021_v13  ;;  %v2032_v6 = vcombine.high %v2028_v18, %v2028_v18  ;;  %2237 = vst.msk [vmem:[%s4811_s30 + $0xa4] sm:$0x1] %vm2195_vm8, %v2021_v13 }
 0x296   : > { %2238 = vst.msk [vmem:[%s4811_s30 + $0xa8] sm:$0x1] %vm2195_vm8, %v2029_v34  ;;  %2241 = vst.msk [vmem:[%s4811_s30 + $0xb4] sm:$0x1] %vm2195_vm8, %v2028_v18  ;;  %v2537_v51 = vcombine.high %v2281_v45, %v2281_v45  ;;  %v2544_v63 = vrot.slane %v2281_v45, %v4765_v54  ;;  %v3089_v27 = vcombine.high %v2833_v58, %v2833_v58 }
 0x297   : > { %2242 = vst.msk [vmem:[%s4811_s30 + $0xb8] sm:$0x1] %vm2195_vm8, %v2030_v37  ;;  %v3096_v30 = vrot.slane %v2833_v58, %v4765_v54  ;;  %v1719_v41 = vsub.f32 %v5537_v22, %v1711_v36  ;;  %v2272_v61 = vsub.f32 %v5538_v3, %v2264_v16  ;;  %2239 = vst.msk [vmem:[%s4811_s30 + $0xac] sm:$0x1] %vm2195_vm8, %v2031_v44 }
 0x298   : > { %2243 = vst.msk [vmem:[%s4811_s30 + $0xbc] sm:$0x1] %vm2195_vm8, %v2032_v6  ;;  %v2551_v40 = vrot.slane %v2537_v51, %v4765_v54  ;;  %v2552_v10 = vcombine.high %v2544_v63, %v2544_v63  ;;  %v2560_v29 = vrot.slane %v2544_v63, %v4765_v54  ;;  %v2816_v23 = vmul.f32 %v1692_v47, %v4739_v14 }
 0x299   : > { %v3103_v5 = vrot.slane %v3089_v27, %v4765_v54  ;;  %v3104_v20 = vcombine.high %v3096_v30, %v3096_v30  ;;  %v3112_v42 = vrot.slane %v3096_v30, %v4765_v54  ;;  %v1727_v28 = vsel %vm1703_vm15, %v5537_v22, %v1719_v41 }
 0x29a   : > { %v2553_v50 = vcombine.high %v2551_v40, %v2551_v40  ;;  %v2567_v4 = vrot.slane %v2551_v40, %v4765_v54  ;;  %v2574_v9 = vrot.slane %v2552_v10, %v4765_v54  ;;  %v2582_v11 = vcombine.high %v2560_v29, %v2560_v29  ;;  %2788 = vst.msk [vmem:[%s4811_s30 + $0xa1] sm:$0x1] %vm2195_vm8, %v2560_v29 }
 0x29b   : > { %v3105_v14 = vcombine.high %v3103_v5, %v3103_v5  ;;  %v3119_v25 = vrot.slane %v3103_v5, %v4765_v54  ;;  %v3126_v55 = vrot.slane %v3104_v20, %v4765_v54  ;;  %v3134_v7 = vcombine.high %v3112_v42, %v3112_v42  ;;  %3340 = vst.msk [vmem:[%s4811_s30 + $0xa2] sm:$0x1] %vm2195_vm8, %v3112_v42 }
 0x29c   : > { %v2581_v31 = vrot.slane %v2553_v50, %v4765_v54  ;;  %v2583_v59 = vcombine.high %v2567_v4, %v2567_v4  ;;  %v2584_v12 = vcombine.high %v2574_v9, %v2574_v9  ;;  %2789 = vst.msk [vmem:[%s4811_s30 + $0xa5] sm:$0x1] %vm2195_vm8, %v2574_v9  ;;  %2790 = vst.msk [vmem:[%s4811_s30 + $0xa9] sm:$0x1] %vm2195_vm8, %v2582_v11  ;;  %v5540_v9 = vld [vmem:[#allocation11_spill] sm:$0xff] }
 0x29d   : > { %2792 = vst.msk [vmem:[%s4811_s30 + $0xb1] sm:$0x1] %vm2195_vm8, %v2567_v4  ;;  %v1935_v38 = vcombine.high %v1727_v28, %v1727_v28  ;;  %v3133_v21 = vrot.slane %v3105_v14, %v4765_v54  ;;  %v3135_v26 = vcombine.high %v3119_v25, %v3119_v25  ;;  %v3136_v19 = vcombine.high %v3126_v55, %v3126_v55  ;;  %v5541_v14 = vld [vmem:[#allocation12_spill] sm:$0xff] }
 0x29e   : > { %3341 = vst.msk [vmem:[%s4811_s30 + $0xa6] sm:$0x1] %vm2195_vm8, %v3126_v55  ;;  %3342 = vst.msk [vmem:[%s4811_s30 + $0xaa] sm:$0x1] %vm2195_vm8, %v3134_v7  ;;  %v1942_v49 = vrot.slane %v1727_v28, %v4765_v54  ;;  %v2585_v48 = vcombine.high %v2581_v31, %v2581_v31  ;;  %v2280_v33 = vsel %vm1703_vm15, %v5538_v3, %v2272_v61  ;;  %v5542_v7 = vld [vmem:[#allocation13_spill] sm:$0xff] }
 0x29f   : > { %3344 = vst.msk [vmem:[%s4811_s30 + $0xb2] sm:$0x1] %vm2195_vm8, %v3119_v25  ;;  %2791 = vst.msk [vmem:[%s4811_s30 + $0xad] sm:$0x1] %vm2195_vm8, %v2584_v12  ;;  %v1949_v0 = vrot.slane %v1935_v38, %v4765_v54  ;;  %v2824_v8 = vsub.f32 %v5539_v56, %v2816_v23  ;;  %v3137_v17 = vcombine.high %v3133_v21, %v3133_v21 }
 0x2a0   : > { %2793 = vst.msk [vmem:[%s4811_s30 + $0xb5] sm:$0x1] %vm2195_vm8, %v2581_v31  ;;  %2794 = vst.msk [vmem:[%s4811_s30 + $0xb9] sm:$0x1] %vm2195_vm8, %v2583_v59  ;;  %v1950_v15 = vcombine.high %v1942_v49, %v1942_v49  ;;  %v1958_v39 = vrot.slane %v1942_v49, %v4765_v54  ;;  %v2488_v2 = vcombine.high %v2280_v33, %v2280_v33  ;;  %v5543_v59 = vld [vmem:[#allocation14_spill] sm:$0xff] }
 0x2a1   : > { %3343 = vst.msk [vmem:[%s4811_s30 + $0xae] sm:$0x1] %vm2195_vm8, %v3136_v19  ;;  %3345 = vst.msk [vmem:[%s4811_s30 + $0xb6] sm:$0x1] %vm2195_vm8, %v3133_v21  ;;  %v1951_v46 = vcombine.high %v1949_v0, %v1949_v0  ;;  %v1965_v1 = vrot.slane %v1949_v0, %v4765_v54  ;;  %v2495_v47 = vrot.slane %v2280_v33, %v4765_v54  ;;  %v5544_v21 = vld [vmem:[#allocation5_spill] sm:$0xff]  ;;  %v5545_v19 = vld [vmem:[#allocation6_spill] sm:$0xff] }
 0x2a2   : > { %3346 = vst.msk [vmem:[%s4811_s30 + $0xba] sm:$0x1] %vm2195_vm8, %v3135_v26  ;;  %2795 = vst.msk [vmem:[%s4811_s30 + $0xbd] sm:$0x1] %vm2195_vm8, %v2585_v48  ;;  %v2832_v13 = vsel %vm1703_vm15, %v5539_v56, %v2824_v8  ;;  %v1972_v18 = vrot.slane %v1950_v15, %v4765_v54  ;;  %v1980_v34 = vcombine.high %v1958_v39, %v1958_v39  ;;  %v5546_v0 = vld [vmem:[#allocation7_spill] sm:$0xff]  ;;  %v5547_v56 = vld [vmem:[#allocation8_spill] sm:$0xff] }
 0x2a3   : > { %3347 = vst.msk [vmem:[%s4811_s30 + $0xbe] sm:$0x1] %vm2195_vm8, %v3137_v17  ;;  %2228 = vst.msk [vmem:[%s4811_s30 + $0x80] sm:$0x1] %vm2195_vm8, %v1958_v39  ;;  %v2502_v37 = vrot.slane %v2488_v2, %v4765_v54  ;;  %v3040_v45 = vcombine.high %v2832_v13, %v2832_v13  ;;  %v1979_v58 = vrot.slane %v1951_v46, %v4765_v54  ;;  %v5548_v39 = vld [vmem:[#allocation9_spill] sm:$0xff] }
 0x2a4   : > { %v1981_v36 = vcombine.high %v1965_v1, %v1965_v1  ;;  %2232 = vst.msk [vmem:[%s4811_s30 + $0x90] sm:$0x1] %vm2195_vm8, %v1965_v1  ;;  %v2503_v52 = vcombine.high %v2495_v47, %v2495_v47  ;;  %v2511_v43 = vrot.slane %v2495_v47, %v4765_v54  ;;  %v1982_v16 = vcombine.high %v1972_v18, %v1972_v18 }
 0x2a5   : > { %2229 = vst.msk [vmem:[%s4811_s30 + $0x84] sm:$0x1] %vm2195_vm8, %v1972_v18  ;;  %2230 = vst.msk [vmem:[%s4811_s30 + $0x88] sm:$0x1] %vm2195_vm8, %v1980_v34  ;;  %v2504_v44 = vcombine.high %v2502_v37, %v2502_v37  ;;  %v2518_v6 = vrot.slane %v2502_v37, %v4765_v54  ;;  %v3047_v51 = vrot.slane %v2832_v13, %v4765_v54 }
 0x2a6   : > { %v1983_v63 = vcombine.high %v1979_v58, %v1979_v58  ;;  %2233 = vst.msk [vmem:[%s4811_s30 + $0x94] sm:$0x1] %vm2195_vm8, %v1979_v58  ;;  %2234 = vst.msk [vmem:[%s4811_s30 + $0x98] sm:$0x1] %vm2195_vm8, %v1981_v36  ;;  %v2525_v27 = vrot.slane %v2503_v52, %v4765_v54  ;;  %v2533_v30 = vcombine.high %v2511_v43, %v2511_v43 }
 0x2a7   : > { %2780 = vst.msk [vmem:[%s4811_s30 + $0x81] sm:$0x1] %vm2195_vm8, %v2511_v43  ;;  %v3054_v22 = vrot.slane %v3040_v45, %v4765_v54  ;;  %2231 = vst.msk [vmem:[%s4811_s30 + $0x8c] sm:$0x1] %vm2195_vm8, %v1982_v16  ;;  %v2532_v41 = vrot.slane %v2504_v44, %v4765_v54  ;;  %v2534_v3 = vcombine.high %v2518_v6, %v2518_v6 }
 0x2a8   : > { %2784 = vst.msk [vmem:[%s4811_s30 + $0x91] sm:$0x1] %vm2195_vm8, %v2518_v6  ;;  %v3055_v61 = vcombine.high %v3047_v51, %v3047_v51  ;;  %v3063_v40 = vrot.slane %v3047_v51, %v4765_v54  ;;  %2235 = vst.msk [vmem:[%s4811_s30 + $0x9c] sm:$0x1] %vm2195_vm8, %v1983_v63  ;;  %v2535_v10 = vcombine.high %v2525_v27, %v2525_v27 }
 0x2a9   : > { %2781 = vst.msk [vmem:[%s4811_s30 + $0x85] sm:$0x1] %vm2195_vm8, %v2525_v27  ;;  %2782 = vst.msk [vmem:[%s4811_s30 + $0x89] sm:$0x1] %vm2195_vm8, %v2533_v30  ;;  %v3056_v29 = vcombine.high %v3054_v22, %v3054_v22  ;;  %v3070_v23 = vrot.slane %v3054_v22, %v4765_v54  ;;  %v1698_v5 = vmul.f32 %v4837_v32, %v4761_v62 }
 0x2aa   : > { %v2536_v20 = vcombine.high %v2532_v41, %v2532_v41  ;;  %2785 = vst.msk [vmem:[%s4811_s30 + $0x95] sm:$0x1] %vm2195_vm8, %v2532_v41  ;;  %2786 = vst.msk [vmem:[%s4811_s30 + $0x99] sm:$0x1] %vm2195_vm8, %v2534_v3  ;;  %v3077_v42 = vrot.slane %v3055_v61, %v4765_v54  ;;  %v3085_v28 = vcombine.high %v3063_v40, %v3063_v40 }
 0x2ab   : > { %3332 = vst.msk [vmem:[%s4811_s30 + $0x82] sm:$0x1] %vm2195_vm8, %v3063_v40  ;;  %v1696_v50 = vmul.f32 %v4843_v24, %v4763_v53  ;;  %2783 = vst.msk [vmem:[%s4811_s30 + $0x8d] sm:$0x1] %vm2195_vm8, %v2535_v10  ;;  %v3084_v32 = vrot.slane %v3056_v29, %v4765_v54  ;;  %v3086_v4 = vcombine.high %v3070_v23, %v3070_v23 }
 0x2ac   : > { %3336 = vst.msk [vmem:[%s4811_s30 + $0x92] sm:$0x1] %vm2195_vm8, %v3070_v23  ;;  %v1714_v11 = vmul.f32 %v5540_v9, %v1698_v5  ;;  %v2267_v25 = vmul.f32 %v5541_v14, %v1698_v5  ;;  %2787 = vst.msk [vmem:[%s4811_s30 + $0x9d] sm:$0x1] %vm2195_vm8, %v2536_v20  ;;  %v3087_v55 = vcombine.high %v3077_v42, %v3077_v42 }
 0x2ad   : > { %3333 = vst.msk [vmem:[%s4811_s30 + $0x86] sm:$0x1] %vm2195_vm8, %v3077_v42  ;;  %3334 = vst.msk [vmem:[%s4811_s30 + $0x8a] sm:$0x1] %vm2195_vm8, %v3085_v28  ;;  %v2819_v24 = vmul.f32 %v4749_v60, %v1698_v5  ;;  %v1713_v31 = vmul.f32 %v1696_v50, %v5542_v7  ;;  %v2266_v12 = vmul.f32 %v1696_v50, %v5543_v59 }
 0x2ae   : > { %v3088_v38 = vcombine.high %v3084_v32, %v3084_v32  ;;  %3337 = vst.msk [vmem:[%s4811_s30 + $0x96] sm:$0x1] %vm2195_vm8, %v3084_v32  ;;  %3338 = vst.msk [vmem:[%s4811_s30 + $0x9a] sm:$0x1] %vm2195_vm8, %v3086_v4  ;;  %v1722_v26 = vsub.f32 %v5544_v21, %v1714_v11  ;;  %v2275_v49 = vsub.f32 %v5545_v19, %v2267_v25 }
 0x2af   : > { %v2818_v48 = vmul.f32 %v1696_v50, %v4755_v35  ;;  %3335 = vst.msk [vmem:[%s4811_s30 + $0x8e] sm:$0x1] %vm2195_vm8, %v3087_v55  ;;  %v2827_v60 = vsub.f32 %v4536_v57, %v2819_v24  ;;  %v1721_v33 = vsub.f32 %v5546_v0, %v1713_v31  ;;  %v2274_v8 = vsub.f32 %v5547_v56, %v2266_v12 }
 0x2b0   : > { %3339 = vst.msk [vmem:[%s4811_s30 + $0x9e] sm:$0x1] %vm2195_vm8, %v3088_v38  ;;  %v1730_v17 = vsel %vm1706_vm0, %v5544_v21, %v1722_v26  ;;  %v2283_v15 = vsel %vm1706_vm0, %v5545_v19, %v2275_v49 }
 0x2b1   : > { %v2826_v35 = vsub.f32 %v5548_v39, %v2818_v48  ;;  %v2082_v2 = vcombine.high %v1730_v17, %v1730_v17  ;;  %v2089_v46 = vrot.slane %v1730_v17, %v4765_v54  ;;  %v2635_v62 = vcombine.high %v2283_v15, %v2283_v15 }
 0x2b2   : > { %v2642_v1 = vrot.slane %v2283_v15, %v4765_v54  ;;  %v2835_v47 = vsel %vm1706_vm0, %v4536_v57, %v2827_v60  ;;  %v1729_v13 = vsel %vm1705_vm1, %v5546_v0, %v1721_v33  ;;  %v5346_v18 = vsel %vm1705_vm1, %v5547_v56, %v2274_v8 }
 0x2b3   : > { %v5349_v34 = vsel %vm1705_vm1, %v5548_v39, %v2826_v35  ;;  %v2096_v53 = vrot.slane %v2082_v2, %v4765_v54  ;;  %v2097_v37 = vcombine.high %v2089_v46, %v2089_v46  ;;  %v2105_v45 = vrot.slane %v2089_v46, %v4765_v54 }
 0x2b4   : > { %v2649_v58 = vrot.slane %v2635_v62, %v4765_v54  ;;  %v2650_v36 = vcombine.high %v2642_v1, %v2642_v1  ;;  %v2658_v57 = vrot.slane %v2642_v1, %v4765_v54  ;;  %v3187_v52 = vcombine.high %v2835_v47, %v2835_v47 }
 0x2b5   : > { %v3194_v43 = vrot.slane %v2835_v47, %v4765_v54  ;;  %v2098_v16 = vcombine.high %v2096_v53, %v2096_v53  ;;  %v2112_v44 = vrot.slane %v2096_v53, %v4765_v54  ;;  %v2119_v6 = vrot.slane %v2097_v37, %v4765_v54  ;;  %2252 = vst.msk [vmem:[%s4811_s30 + $0xe0] sm:$0x1] %vm2195_vm8, %v2105_v45 }
 0x2b6   : > { %v2127_v51 = vcombine.high %v2105_v45, %v2105_v45  ;;  %v2651_v63 = vcombine.high %v2649_v58, %v2649_v58  ;;  %v2665_v27 = vrot.slane %v2649_v58, %v4765_v54  ;;  %v2672_v30 = vrot.slane %v2650_v36, %v4765_v54  ;;  %2804 = vst.msk [vmem:[%s4811_s30 + $0xe1] sm:$0x1] %vm2195_vm8, %v2658_v57 }
 0x2b7   : > { %v2680_v22 = vcombine.high %v2658_v57, %v2658_v57  ;;  %v2126_v41 = vrot.slane %v2098_v16, %v4765_v54  ;;  %v2128_v3 = vcombine.high %v2112_v44, %v2112_v44  ;;  %v2129_v61 = vcombine.high %v2119_v6, %v2119_v6  ;;  %2253 = vst.msk [vmem:[%s4811_s30 + $0xe4] sm:$0x1] %vm2195_vm8, %v2119_v6 }
 0x2b8   : > { %2254 = vst.msk [vmem:[%s4811_s30 + $0xe8] sm:$0x1] %vm2195_vm8, %v2127_v51  ;;  %2256 = vst.msk [vmem:[%s4811_s30 + $0xf0] sm:$0x1] %vm2195_vm8, %v2112_v44  ;;  %v3201_v40 = vrot.slane %v3187_v52, %v4765_v54  ;;  %v2679_v10 = vrot.slane %v2651_v63, %v4765_v54  ;;  %v2681_v29 = vcombine.high %v2665_v27, %v2665_v27 }
 0x2b9   : > { %v2682_v23 = vcombine.high %v2672_v30, %v2672_v30  ;;  %2805 = vst.msk [vmem:[%s4811_s30 + $0xe5] sm:$0x1] %vm2195_vm8, %v2672_v30  ;;  %2806 = vst.msk [vmem:[%s4811_s30 + $0xe9] sm:$0x1] %vm2195_vm8, %v2680_v22  ;;  %v3202_v5 = vcombine.high %v3194_v43, %v3194_v43  ;;  %v2130_v20 = vcombine.high %v2126_v41, %v2126_v41 }
 0x2ba   : > { %2808 = vst.msk [vmem:[%s4811_s30 + $0xf1] sm:$0x1] %vm2195_vm8, %v2665_v27  ;;  %2255 = vst.msk [vmem:[%s4811_s30 + $0xec] sm:$0x1] %vm2195_vm8, %v2129_v61  ;;  %v3203_v42 = vcombine.high %v3201_v40, %v3201_v40  ;;  %v3210_v28 = vrot.slane %v3194_v43, %v4765_v54  ;;  %v3217_v50 = vrot.slane %v3201_v40, %v4765_v54 }
 0x2bb   : > { %2257 = vst.msk [vmem:[%s4811_s30 + $0xf4] sm:$0x1] %vm2195_vm8, %v2126_v41  ;;  %2258 = vst.msk [vmem:[%s4811_s30 + $0xf8] sm:$0x1] %vm2195_vm8, %v2128_v3  ;;  %v2683_v32 = vcombine.high %v2679_v10, %v2679_v10  ;;  %v3224_v4 = vrot.slane %v3202_v5, %v4765_v54  ;;  %v2033_v9 = vcombine.high %v1729_v13, %v1729_v13 }
 0x2bc   : > { %2807 = vst.msk [vmem:[%s4811_s30 + $0xed] sm:$0x1] %vm2195_vm8, %v2682_v23  ;;  %2809 = vst.msk [vmem:[%s4811_s30 + $0xf5] sm:$0x1] %vm2195_vm8, %v2679_v10  ;;  %v2040_v11 = vrot.slane %v1729_v13, %v4765_v54  ;;  %v3231_v14 = vrot.slane %v3203_v42, %v4765_v54  ;;  %v3232_v25 = vcombine.high %v3210_v28, %v3210_v28 }
 0x2bd   : > { %2810 = vst.msk [vmem:[%s4811_s30 + $0xf9] sm:$0x1] %vm2195_vm8, %v2681_v29  ;;  %2259 = vst.msk [vmem:[%s4811_s30 + $0xfc] sm:$0x1] %vm2195_vm8, %v2130_v20  ;;  %v3233_v55 = vcombine.high %v3217_v50, %v3217_v50  ;;  %v2586_v24 = vcombine.high %v5346_v18, %v5346_v18  ;;  %v3234_v7 = vcombine.high %v3224_v4, %v3224_v4 }
 0x2be   : > { %3356 = vst.msk [vmem:[%s4811_s30 + $0xe2] sm:$0x1] %vm2195_vm8, %v3210_v28  ;;  %3360 = vst.msk [vmem:[%s4811_s30 + $0xf2] sm:$0x1] %vm2195_vm8, %v3217_v50  ;;  %v2047_v31 = vrot.slane %v2033_v9, %v4765_v54  ;;  %v2048_v59 = vcombine.high %v2040_v11, %v2040_v11  ;;  %v2056_v12 = vrot.slane %v2040_v11, %v4765_v54 }
 0x2bf   : > { %2811 = vst.msk [vmem:[%s4811_s30 + $0xfd] sm:$0x1] %vm2195_vm8, %v2683_v32  ;;  %3357 = vst.msk [vmem:[%s4811_s30 + $0xe6] sm:$0x1] %vm2195_vm8, %v3224_v4  ;;  %v3235_v38 = vcombine.high %v3231_v14, %v3231_v14  ;;  %v2593_v21 = vrot.slane %v5346_v18, %v4765_v54  ;;  %v2600_v26 = vrot.slane %v2586_v24, %v4765_v54 }
 0x2c0   : > { %3358 = vst.msk [vmem:[%s4811_s30 + $0xea] sm:$0x1] %vm2195_vm8, %v3232_v25  ;;  %3361 = vst.msk [vmem:[%s4811_s30 + $0xf6] sm:$0x1] %vm2195_vm8, %v3231_v14  ;;  %v3138_v19 = vcombine.high %v5349_v34, %v5349_v34  ;;  %v2049_v49 = vcombine.high %v2047_v31, %v2047_v31  ;;  %v2063_v48 = vrot.slane %v2047_v31, %v4765_v54 }
 0x2c1   : > { %3362 = vst.msk [vmem:[%s4811_s30 + $0xfa] sm:$0x1] %vm2195_vm8, %v3233_v55  ;;  %3359 = vst.msk [vmem:[%s4811_s30 + $0xee] sm:$0x1] %vm2195_vm8, %v3234_v7  ;;  %v2070_v60 = vrot.slane %v2048_v59, %v4765_v54  ;;  %v2078_v0 = vcombine.high %v2056_v12, %v2056_v12  ;;  %v2601_v33 = vcombine.high %v2593_v21, %v2593_v21 }
 0x2c2   : > { %2244 = vst.msk [vmem:[%s4811_s30 + $0xc0] sm:$0x1] %vm2195_vm8, %v2056_v12  ;;  %3363 = vst.msk [vmem:[%s4811_s30 + $0xfe] sm:$0x1] %vm2195_vm8, %v3235_v38  ;;  %v2602_v56 = vcombine.high %v2600_v26, %v2600_v26  ;;  %v2609_v8 = vrot.slane %v2593_v21, %v4765_v54  ;;  %v2616_v17 = vrot.slane %v2600_v26, %v4765_v54 }
 0x2c3   : > { %v2077_v15 = vrot.slane %v2049_v49, %v4765_v54  ;;  %v2079_v39 = vcombine.high %v2063_v48, %v2063_v48  ;;  %v2080_v35 = vcombine.high %v2070_v60, %v2070_v60  ;;  %2245 = vst.msk [vmem:[%s4811_s30 + $0xc4] sm:$0x1] %vm2195_vm8, %v2070_v60  ;;  %2246 = vst.msk [vmem:[%s4811_s30 + $0xc8] sm:$0x1] %vm2195_vm8, %v2078_v0 }
 0x2c4   : > { %2248 = vst.msk [vmem:[%s4811_s30 + $0xd0] sm:$0x1] %vm2195_vm8, %v2063_v48  ;;  %v3145_v2 = vrot.slane %v5349_v34, %v4765_v54  ;;  %v2623_v46 = vrot.slane %v2601_v33, %v4765_v54  ;;  %v2630_v62 = vrot.slane %v2602_v56, %v4765_v54  ;;  %v2631_v1 = vcombine.high %v2609_v8, %v2609_v8 }
 0x2c5   : > { %v2632_v47 = vcombine.high %v2616_v17, %v2616_v17  ;;  %2796 = vst.msk [vmem:[%s4811_s30 + $0xc1] sm:$0x1] %vm2195_vm8, %v2609_v8  ;;  %2800 = vst.msk [vmem:[%s4811_s30 + $0xd1] sm:$0x1] %vm2195_vm8, %v2616_v17  ;;  %v2081_v13 = vcombine.high %v2077_v15, %v2077_v15  ;;  %v3152_v18 = vrot.slane %v3138_v19, %v4765_v54 }
 0x2c6   : > { %2247 = vst.msk [vmem:[%s4811_s30 + $0xcc] sm:$0x1] %vm2195_vm8, %v2080_v35  ;;  %2249 = vst.msk [vmem:[%s4811_s30 + $0xd4] sm:$0x1] %vm2195_vm8, %v2077_v15  ;;  %v3153_v34 = vcombine.high %v3145_v2, %v3145_v2  ;;  %v3161_v53 = vrot.slane %v3145_v2, %v4765_v54  ;;  %v2633_v37 = vcombine.high %v2623_v46, %v2623_v46 }
 0x2c7   : > { %2250 = vst.msk [vmem:[%s4811_s30 + $0xd8] sm:$0x1] %vm2195_vm8, %v2079_v39  ;;  %v2634_v45 = vcombine.high %v2630_v62, %v2630_v62  ;;  %2797 = vst.msk [vmem:[%s4811_s30 + $0xc5] sm:$0x1] %vm2195_vm8, %v2623_v46  ;;  %v3154_v58 = vcombine.high %v3152_v18, %v3152_v18  ;;  %v3168_v36 = vrot.slane %v3152_v18, %v4765_v54 }
 0x2c8   : > { %2798 = vst.msk [vmem:[%s4811_s30 + $0xc9] sm:$0x1] %vm2195_vm8, %v2631_v1  ;;  %2801 = vst.msk [vmem:[%s4811_s30 + $0xd5] sm:$0x1] %vm2195_vm8, %v2630_v62  ;;  %v3175_v57 = vrot.slane %v3153_v34, %v4765_v54  ;;  %v3183_v52 = vcombine.high %v3161_v53, %v3161_v53 }
 0x2c9   : > { %2802 = vst.msk [vmem:[%s4811_s30 + $0xd9] sm:$0x1] %vm2195_vm8, %v2632_v47  ;;  %2251 = vst.msk [vmem:[%s4811_s30 + $0xdc] sm:$0x1] %vm2195_vm8, %v2081_v13  ;;  %v3182_v43 = vrot.slane %v3154_v58, %v4765_v54  ;;  %v3184_v16 = vcombine.high %v3168_v36, %v3168_v36 }
 0x2ca   : > { %3348 = vst.msk [vmem:[%s4811_s30 + $0xc2] sm:$0x1] %vm2195_vm8, %v3161_v53  ;;  %2799 = vst.msk [vmem:[%s4811_s30 + $0xcd] sm:$0x1] %vm2195_vm8, %v2633_v37  ;;  %v3185_v44 = vcombine.high %v3175_v57, %v3175_v57 }
 0x2cb   : > { %2803 = vst.msk [vmem:[%s4811_s30 + $0xdd] sm:$0x1] %vm2195_vm8, %v2634_v45  ;;  %3349 = vst.msk [vmem:[%s4811_s30 + $0xc6] sm:$0x1] %vm2195_vm8, %v3175_v57  ;;  %v3186_v6 = vcombine.high %v3182_v43, %v3182_v43 }
 0x2cc   : > { %3350 = vst.msk [vmem:[%s4811_s30 + $0xca] sm:$0x1] %vm2195_vm8, %v3183_v52  ;;  %3352 = vst.msk [vmem:[%s4811_s30 + $0xd2] sm:$0x1] %vm2195_vm8, %v3168_v36 }
 0x2cd   : > { %3351 = vst.msk [vmem:[%s4811_s30 + $0xce] sm:$0x1] %vm2195_vm8, %v3185_v44  ;;  %3353 = vst.msk [vmem:[%s4811_s30 + $0xd6] sm:$0x1] %vm2195_vm8, %v3182_v43 }
 0x2ce   : > { %3354 = vst.msk [vmem:[%s4811_s30 + $0xda] sm:$0x1] %vm2195_vm8, %v3184_v16  ;;  %3355 = vst.msk [vmem:[%s4811_s30 + $0xde] sm:$0x1] %vm2195_vm8, %v3186_v6 }
 0x2cf PF: > { %s15_s20 = sadd.s32 1, %s3906_s20   ;;  %s5549_s18 = smov %s3902_s19 }
 0x2d0   : > { %p12_p5 = scmp.ge.s32.totalorder %s15_s20, 4   ;;  %s5550_s19 = smov %s5552_s21 }
 0x2d2   :  { %14 = sbr.rel (!%p12_p5) target bundleno = 2 (0x2), region = 70 }

</bundles_post_ra>
